<compile_context>
chip_gen: v7x
topology: tpu7x:2x2x1
jax: 0.10.0
libtpu: 0.0.40
codegen_flags: <defaults>
</compile_context>

<pallas_src>
import functools

import jax
import jax.numpy as jnp
from jax.experimental import pallas as pl
from jax.experimental.pallas import tpu as pltpu

_BN_EPS = 1e-5


def _vmem_spec():
    return pl.BlockSpec(memory_space=pltpu.MemorySpace.VMEM)


# ------------------------------- fused kernel -------------------------------

def _basic_block_kernel(*refs, stride, identity, eps, n, ho, wo, cin, planes):
    """Whole BasicBlock forward on VMEM-resident tensors.

    refs (inputs):  xph, w1, w2, [ws], bn1_g, bn1_b, bn2_g, bn2_b, [bns_g, bns_b]
    refs (outputs): out (N,Ho,Wo,P), preact (N,Ho,Wo,P)
    refs (scratch): y1p (N,Ho+2,Wo+2,P) f32  -- zero-padded conv2 input
    """
    if identity:
        (xph_ref, w1_ref, w2_ref,
         g1_ref, b1_ref, g2_ref, b2_ref,
         out_ref, pre_ref, y1p_ref) = refs
        ws_ref = gs_ref = bs_ref = None
    else:
        (xph_ref, w1_ref, w2_ref, ws_ref,
         g1_ref, b1_ref, g2_ref, b2_ref, gs_ref, bs_ref,
         out_ref, pre_ref, y1p_ref) = refs

    s = stride
    m = n * ho * wo
    inv_cnt = 1.0 / float(m)

    # ---- conv1: 3x3, stride s, pad 1, bias-free -> 9 shifted MXU dots ----
    acc1 = jnp.zeros((m, planes), jnp.float32)
    for ki in range(3):
        for kj in range(3):
            ph = (ki % s) * s + (kj % s)          # which stride-phase slab
            qi, qj = ki // s, kj // s             # unit-stride offset inside it
            tap = xph_ref[ph, :, qi:qi + ho, qj:qj + wo, :]
            tap = tap.astype(jnp.bfloat16).reshape(m, cin)
            acc1 = acc1 + jnp.dot(tap, w1_ref[ki * 3 + kj],
                                  preferred_element_type=jnp.float32)

    # ---- BN1 (batch stats, biased variance) + ReLU ----
    mean1 = jnp.sum(acc1, axis=0, keepdims=True) * inv_cnt
    d1 = acc1 - mean1
    var1 = jnp.sum(d1 * d1, axis=0, keepdims=True) * inv_cnt
    y1 = jnp.maximum(d1 * jax.lax.rsqrt(var1 + eps) * g1_ref[...] + b1_ref[...], 0.0)

    # ---- conv2: 3x3, stride 1, pad 1, bias-free ----
    # Stage the zero-padded conv2 input in a VMEM scratch (halo zeroed explicitly).
    y1p_ref[...] = jnp.zeros((n, ho + 2, wo + 2, planes), jnp.float32)
    y1p_ref[:, 1:1 + ho, 1:1 + wo, :] = y1.reshape(n, ho, wo, planes)

    acc2 = jnp.zeros((m, planes), jnp.float32)
    for ki in range(3):
        for kj in range(3):
            tap = y1p_ref[:, ki:ki + ho, kj:kj + wo, :].astype(jnp.bfloat16)
            acc2 = acc2 + jnp.dot(tap.reshape(m, planes), w2_ref[ki * 3 + kj],
                                  preferred_element_type=jnp.float32)

    # ---- BN2 (no ReLU before the residual add) ----
    mean2 = jnp.sum(acc2, axis=0, keepdims=True) * inv_cnt
    d2 = acc2 - mean2
    var2 = jnp.sum(d2 * d2, axis=0, keepdims=True) * inv_cnt
    y2 = d2 * jax.lax.rsqrt(var2 + eps) * g2_ref[...] + b2_ref[...]

    # ---- shortcut: identity, or 1x1 stride-s conv (bias-free) + BN ----
    a, q = 1 % s, 1 // s
    ph = a * s + a
    if identity:
        sc = xph_ref[ph, :, q:q + ho, q:q + wo, :].reshape(m, planes)
    else:
        xs = xph_ref[ph, :, q:q + ho, q:q + wo, :]
        xs = xs.astype(jnp.bfloat16).reshape(m, cin)
        accs = jnp.dot(xs, ws_ref[...], preferred_element_type=jnp.float32)
        means = jnp.sum(accs, axis=0, keepdims=True) * inv_cnt
        ds = accs - means
        vars_ = jnp.sum(ds * ds, axis=0, keepdims=True) * inv_cnt
        sc = ds * jax.lax.rsqrt(vars_ + eps) * gs_ref[...] + bs_ref[...]

    # ---- residual add, preact, ReLU ----
    pre = y2 + sc
    pre_ref[...] = pre.reshape(n, ho, wo, planes)
    out_ref[...] = jnp.maximum(pre, 0.0).reshape(n, ho, wo, planes)


# ------------------------------ wrapper / glue ------------------------------

def basic_block_forward(params, x_nchw, *, stride=1, is_last=False):
    n, cin, h, w = x_nchw.shape
    planes = params['w1'].shape[-1]
    s = int(stride)
    assert s in (1, 2), "demo wrapper supports stride 1 or 2"
    if s == 2:
        assert h % 2 == 0 and w % 2 == 0

    ho = (h + 2 - 3) // s + 1
    wo = (w + 2 - 3) // s + 1
    identity = (s == 1 and cin == planes)

    # NCHW -> NHWC (channels on lanes), pad=1, and (for stride 2) a 2x2 phase
    # decomposition of the padded input so every in-kernel tap slice is unit-stride
    # (total phase-tensor size == padded-input size: no HBM blow-up).
    x = jnp.transpose(x_nchw, (0, 2, 3, 1)).astype(jnp.float32)
    xp = jnp.pad(x, ((0, 0), (1, 1), (1, 1), (0, 0)))
    if s == 1:
        phases = xp[None]
    else:
        phases = jnp.stack(
            [xp[:, a::2, b::2, :] for a in range(2) for b in range(2)], axis=0)

    w1 = params['w1'].reshape(9, cin, planes).astype(jnp.bfloat16)
    w2 = params['w2'].reshape(9, planes, planes).astype(jnp.bfloat16)
    args = [phases, w1, w2]
    if not identity:
        args.append(params['ws'].reshape(cin, planes).astype(jnp.bfloat16))
    args += [params['bn1_g'], params['bn1_b'], params['bn2_g'], params['bn2_b']]
    if not identity:
        args += [params['bns_g'], params['bns_b']]

    kernel = functools.partial(
        _basic_block_kernel, stride=s, identity=identity, eps=_BN_EPS,
        n=n, ho=ho, wo=wo, cin=cin, planes=planes)

    out_nhwc, pre_nhwc = pl.pallas_call(
        kernel,
        out_shape=(jax.ShapeDtypeStruct((n, ho, wo, planes), jnp.float32),
                   jax.ShapeDtypeStruct((n, ho, wo, planes), jnp.float32)),
        in_specs=[_vmem_spec()] * len(args),
        out_specs=(_vmem_spec(), _vmem_spec()),
        scratch_shapes=[pltpu.VMEM((n, ho + 2, wo + 2, planes), jnp.float32)],
    )(*args)

    out = jnp.transpose(out_nhwc, (0, 3, 1, 2))       # back to NCHW
    if is_last:
        return out, jnp.transpose(pre_nhwc, (0, 3, 1, 2))
    return out


# --------------------------- params / reference -----------------------------

def init_params(key, in_planes, planes, *, downsample):
    ks = jax.random.split(key, 8)

    def conv_init(k, kh, kw, ci, co):
        fan_in = kh * kw * ci
        return jax.random.normal(k, (kh, kw, ci, co), jnp.float32) * (2.0 / fan_in) ** 0.5

    p = {
        'w1': conv_init(ks[0], 3, 3, in_planes, planes),
        'bn1_g': jax.random.uniform(ks[1], (1, planes), jnp.float32, 0.5, 1.5),
        'bn1_b': 0.1 * jax.random.normal(ks[2], (1, planes), jnp.float32),
        'w2': conv_init(ks[3], 3, 3, planes, planes),
        'bn2_g': jax.random.uniform(ks[4], (1, planes), jnp.float32, 0.5, 1.5),
        'bn2_b': 0.1 * jax.random.normal(ks[5], (1, planes), jnp.float32),
    }
    if downsample:
        p['ws'] = conv_init(ks[6], 1, 1, in_planes, planes)
        p['bns_g'] = jax.random.uniform(ks[7], (1, planes), jnp.float32, 0.5, 1.5)
        p['bns_b'] = jnp.zeros((1, planes), jnp.float32)
    return p


def _reference_forward(params, x_nchw, *, stride, is_last):
    """Pure-JAX f32 reference of BasicBlock.forward (train-mode BN)."""
    x = jnp.transpose(x_nchw, (0, 2, 3, 1))

    def conv(inp, wt, s, pad):
        return jax.lax.conv_general_dilated(
            inp, wt, window_strides=(s, s), padding=[(pad, pad), (pad, pad)],
            dimension_numbers=('NHWC', 'HWIO', 'NHWC'))

    def bn(inp, g, b):
        mean = jnp.mean(inp, axis=(0, 1, 2), keepdims=True)
        var = jnp.mean((inp - mean) ** 2, axis=(0, 1, 2), keepdims=True)
        return ((inp - mean) * jax.lax.rsqrt(var + _BN_EPS)
                * g.reshape(1, 1, 1, -1) + b.reshape(1, 1, 1, -1))

    y = jax.nn.relu(bn(conv(x, params['w1'], stride, 1), params['bn1_g'], params['bn1_b']))
    y = bn(conv(y, params['w2'], 1, 1), params['bn2_g'], params['bn2_b'])
    sc = (bn(conv(x, params['ws'], stride, 0), params['bns_g'], params['bns_b'])
          if 'ws' in params else x)
    pre = y + sc
    out = jax.nn.relu(pre)
    out = jnp.transpose(out, (0, 3, 1, 2))
    pre = jnp.transpose(pre, (0, 3, 1, 2))
    return (out, pre) if is_last else out


# ----------------------------------- main -----------------------------------

if __name__ == "__main__":
    key = jax.random.PRNGKey(0)
    pkey, xkey = jax.random.split(key)

    # BasicBlock(in_planes=64, planes=128, stride=2, is_last=True): exercises the
    # downsampling 1x1-conv+BN shortcut and the (out, preact) return path.
    N, CIN, H, W = 2, 64, 16, 16
    PLANES, STRIDE, IS_LAST = 128, 2, True

    params = init_params(pkey, CIN, PLANES,
                         downsample=(STRIDE != 1 or CIN != PLANES))
    x = jax.random.normal(xkey, (N, CIN, H, W), jnp.float32)

    fwd = jax.jit(functools.partial(basic_block_forward, stride=STRIDE, is_last=IS_LAST))
    out, preact = fwd(params, x)
    jax.block_until_ready((out, preact))

    assert out.shape == (N, PLANES, H // STRIDE, W // STRIDE) and out.dtype == jnp.float32
    assert preact.shape == out.shape and preact.dtype == jnp.float32
    assert bool(jnp.all(out >= 0.0))
    assert bool(jnp.all(out == jnp.maximum(preact, 0.0)))

    # Compare against the pure-JAX f32 reference (tolerance covers bf16 MXU inputs).
    ref_out, ref_pre = _reference_forward(params, x, stride=STRIDE, is_last=True)
    max_err = float(jnp.max(jnp.abs(preact - ref_pre)))
    assert max_err < 0.25, f"max abs error vs reference: {max_err}"

    print("KERNEL_OK")
</pallas_src>

<mosaic_0001>
module attributes {stable_mosaic.version = 11 : i64} {
  func.func @_basic_block_kernel(%arg0: memref<4x2x9x9x64xf32, #tpu.memory_space<vmem>>, %arg1: memref<9x64x128xbf16, #tpu.memory_space<vmem>>, %arg2: memref<9x128x128xbf16, #tpu.memory_space<vmem>>, %arg3: memref<64x128xbf16, #tpu.memory_space<vmem>>, %arg4: memref<1x128xf32, #tpu.memory_space<vmem>>, %arg5: memref<1x128xf32, #tpu.memory_space<vmem>>, %arg6: memref<1x128xf32, #tpu.memory_space<vmem>>, %arg7: memref<1x128xf32, #tpu.memory_space<vmem>>, %arg8: memref<1x128xf32, #tpu.memory_space<vmem>>, %arg9: memref<1x128xf32, #tpu.memory_space<vmem>>, %arg10: memref<2x8x8x128xf32, #tpu.memory_space<vmem>>, %arg11: memref<2x8x8x128xf32, #tpu.memory_space<vmem>>, %arg12: memref<2x10x10x128xf32, #tpu.memory_space<vmem>>) attributes {dimension_semantics = [], scalar_prefetch = 0 : i64, scratch_operands = 1 : i64, tpu.core_type = #tpu.core_type<tc>} {
    %cst = arith.constant 0.000000e+00 : f32
    %0 = vector.broadcast %cst : f32 to vector<128x128xf32>
    %c0 = arith.constant 0 : index
    %c0_0 = arith.constant 0 : index
    %c0_1 = arith.constant 0 : index
    %c0_2 = arith.constant 0 : index
    %c0_3 = arith.constant 0 : index
    %1 = vector.load %arg0[%c0, %c0_0, %c0_1, %c0_2, %c0_3] : memref<4x2x9x9x64xf32, #tpu.memory_space<vmem>>, vector<1x2x8x8x64xf32>
    %2 = vector.shape_cast %1 : vector<1x2x8x8x64xf32> to vector<2x8x8x64xf32>
    %3 = arith.truncf %2 : vector<2x8x8x64xf32> to vector<2x8x8x64xbf16>
    %4 = vector.shape_cast %3 : vector<2x8x8x64xbf16> to vector<128x64xbf16>
    %c0_4 = arith.constant 0 : index
    %c0_5 = arith.constant 0 : index
    %c0_6 = arith.constant 0 : index
    %5 = vector.load %arg1[%c0_4, %c0_5, %c0_6] : memref<9x64x128xbf16, #tpu.memory_space<vmem>>, vector<1x64x128xbf16>
    %6 = vector.shape_cast %5 : vector<1x64x128xbf16> to vector<64x128xbf16>
    %cst_7 = arith.constant dense<0.000000e+00> : vector<128x128xf32>
    %7 = tpu.matmul %4, %6, %cst_7 {dimension_numbers = #tpu.dot_dimension_numbers<[1], [0], [0], [1], [0, 0, 1, 1], [], []>} : vector<128x64xbf16>, vector<64x128xbf16>, vector<128x128xf32> -> vector<128x128xf32>
    %8 = arith.addf %0, %7 : vector<128x128xf32>
    %c1 = arith.constant 1 : index
    %c0_8 = arith.constant 0 : index
    %c0_9 = arith.constant 0 : index
    %c0_10 = arith.constant 0 : index
    %c0_11 = arith.constant 0 : index
    %9 = vector.load %arg0[%c1, %c0_8, %c0_9, %c0_10, %c0_11] : memref<4x2x9x9x64xf32, #tpu.memory_space<vmem>>, vector<1x2x8x8x64xf32>
    %10 = vector.shape_cast %9 : vector<1x2x8x8x64xf32> to vector<2x8x8x64xf32>
    %11 = arith.truncf %10 : vector<2x8x8x64xf32> to vector<2x8x8x64xbf16>
    %12 = vector.shape_cast %11 : vector<2x8x8x64xbf16> to vector<128x64xbf16>
    %c1_12 = arith.constant 1 : index
    %c0_13 = arith.constant 0 : index
    %c0_14 = arith.constant 0 : index
    %13 = vector.load %arg1[%c1_12, %c0_13, %c0_14] : memref<9x64x128xbf16, #tpu.memory_space<vmem>>, vector<1x64x128xbf16>
    %14 = vector.shape_cast %13 : vector<1x64x128xbf16> to vector<64x128xbf16>
    %cst_15 = arith.constant dense<0.000000e+00> : vector<128x128xf32>
    %15 = tpu.matmul %12, %14, %cst_15 {dimension_numbers = #tpu.dot_dimension_numbers<[1], [0], [0], [1], [0, 0, 1, 1], [], []>} : vector<128x64xbf16>, vector<64x128xbf16>, vector<128x128xf32> -> vector<128x128xf32>
    %16 = arith.addf %8, %15 : vector<128x128xf32>
    %c0_16 = arith.constant 0 : index
    %c0_17 = arith.constant 0 : index
    %c0_18 = arith.constant 0 : index
    %c1_19 = arith.constant 1 : index
    %c0_20 = arith.constant 0 : index
    %17 = vector.load %arg0[%c0_16, %c0_17, %c0_18, %c1_19, %c0_20] : memref<4x2x9x9x64xf32, #tpu.memory_space<vmem>>, vector<1x2x8x8x64xf32>
    %18 = vector.shape_cast %17 : vector<1x2x8x8x64xf32> to vector<2x8x8x64xf32>
    %19 = arith.truncf %18 : vector<2x8x8x64xf32> to vector<2x8x8x64xbf16>
    %20 = vector.shape_cast %19 : vector<2x8x8x64xbf16> to vector<128x64xbf16>
    %c2 = arith.constant 2 : index
    %c0_21 = arith.constant 0 : index
    %c0_22 = arith.constant 0 : index
    %21 = vector.load %arg1[%c2, %c0_21, %c0_22] : memref<9x64x128xbf16, #tpu.memory_space<vmem>>, vector<1x64x128xbf16>
    %22 = vector.shape_cast %21 : vector<1x64x128xbf16> to vector<64x128xbf16>
    %cst_23 = arith.constant dense<0.000000e+00> : vector<128x128xf32>
    %23 = tpu.matmul %20, %22, %cst_23 {dimension_numbers = #tpu.dot_dimension_numbers<[1], [0], [0], [1], [0, 0, 1, 1], [], []>} : vector<128x64xbf16>, vector<64x128xbf16>, vector<128x128xf32> -> vector<128x128xf32>
    %24 = arith.addf %16, %23 : vector<128x128xf32>
    %c2_24 = arith.constant 2 : index
    %c0_25 = arith.constant 0 : index
    %c0_26 = arith.constant 0 : index
    %c0_27 = arith.constant 0 : index
    %c0_28 = arith.constant 0 : index
    %25 = vector.load %arg0[%c2_24, %c0_25, %c0_26, %c0_27, %c0_28] : memref<4x2x9x9x64xf32, #tpu.memory_space<vmem>>, vector<1x2x8x8x64xf32>
    %26 = vector.shape_cast %25 : vector<1x2x8x8x64xf32> to vector<2x8x8x64xf32>
    %27 = arith.truncf %26 : vector<2x8x8x64xf32> to vector<2x8x8x64xbf16>
    %28 = vector.shape_cast %27 : vector<2x8x8x64xbf16> to vector<128x64xbf16>
    %c3 = arith.constant 3 : index
    %c0_29 = arith.constant 0 : index
    %c0_30 = arith.constant 0 : index
    %29 = vector.load %arg1[%c3, %c0_29, %c0_30] : memref<9x64x128xbf16, #tpu.memory_space<vmem>>, vector<1x64x128xbf16>
    %30 = vector.shape_cast %29 : vector<1x64x128xbf16> to vector<64x128xbf16>
    %cst_31 = arith.constant dense<0.000000e+00> : vector<128x128xf32>
    %31 = tpu.matmul %28, %30, %cst_31 {dimension_numbers = #tpu.dot_dimension_numbers<[1], [0], [0], [1], [0, 0, 1, 1], [], []>} : vector<128x64xbf16>, vector<64x128xbf16>, vector<128x128xf32> -> vector<128x128xf32>
    %32 = arith.addf %24, %31 : vector<128x128xf32>
    %c3_32 = arith.constant 3 : index
    %c0_33 = arith.constant 0 : index
    %c0_34 = arith.constant 0 : index
    %c0_35 = arith.constant 0 : index
    %c0_36 = arith.constant 0 : index
    %33 = vector.load %arg0[%c3_32, %c0_33, %c0_34, %c0_35, %c0_36] : memref<4x2x9x9x64xf32, #tpu.memory_space<vmem>>, vector<1x2x8x8x64xf32>
    %34 = vector.shape_cast %33 : vector<1x2x8x8x64xf32> to vector<2x8x8x64xf32>
    %35 = arith.truncf %34 : vector<2x8x8x64xf32> to vector<2x8x8x64xbf16>
    %36 = vector.shape_cast %35 : vector<2x8x8x64xbf16> to vector<128x64xbf16>
    %c4 = arith.constant 4 : index
    %c0_37 = arith.constant 0 : index
    %c0_38 = arith.constant 0 : index
    %37 = vector.load %arg1[%c4, %c0_37, %c0_38] : memref<9x64x128xbf16, #tpu.memory_space<vmem>>, vector<1x64x128xbf16>
    %38 = vector.shape_cast %37 : vector<1x64x128xbf16> to vector<64x128xbf16>
    %cst_39 = arith.constant dense<0.000000e+00> : vector<128x128xf32>
    %39 = tpu.matmul %36, %38, %cst_39 {dimension_numbers = #tpu.dot_dimension_numbers<[1], [0], [0], [1], [0, 0, 1, 1], [], []>} : vector<128x64xbf16>, vector<64x128xbf16>, vector<128x128xf32> -> vector<128x128xf32>
    %40 = arith.addf %32, %39 : vector<128x128xf32>
    %c2_40 = arith.constant 2 : index
    %c0_41 = arith.constant 0 : index
    %c0_42 = arith.constant 0 : index
    %c1_43 = arith.constant 1 : index
    %c0_44 = arith.constant 0 : index
    %41 = vector.load %arg0[%c2_40, %c0_41, %c0_42, %c1_43, %c0_44] : memref<4x2x9x9x64xf32, #tpu.memory_space<vmem>>, vector<1x2x8x8x64xf32>
    %42 = vector.shape_cast %41 : vector<1x2x8x8x64xf32> to vector<2x8x8x64xf32>
    %43 = arith.truncf %42 : vector<2x8x8x64xf32> to vector<2x8x8x64xbf16>
    %44 = vector.shape_cast %43 : vector<2x8x8x64xbf16> to vector<128x64xbf16>
    %c5 = arith.constant 5 : index
    %c0_45 = arith.constant 0 : index
    %c0_46 = arith.constant 0 : index
    %45 = vector.load %arg1[%c5, %c0_45, %c0_46] : memref<9x64x128xbf16, #tpu.memory_space<vmem>>, vector<1x64x128xbf16>
    %46 = vector.shape_cast %45 : vector<1x64x128xbf16> to vector<64x128xbf16>
    %cst_47 = arith.constant dense<0.000000e+00> : vector<128x128xf32>
    %47 = tpu.matmul %44, %46, %cst_47 {dimension_numbers = #tpu.dot_dimension_numbers<[1], [0], [0], [1], [0, 0, 1, 1], [], []>} : vector<128x64xbf16>, vector<64x128xbf16>, vector<128x128xf32> -> vector<128x128xf32>
    %48 = arith.addf %40, %47 : vector<128x128xf32>
    %c0_48 = arith.constant 0 : index
    %c0_49 = arith.constant 0 : index
    %c1_50 = arith.constant 1 : index
    %c0_51 = arith.constant 0 : index
    %c0_52 = arith.constant 0 : index
    %49 = vector.load %arg0[%c0_48, %c0_49, %c1_50, %c0_51, %c0_52] : memref<4x2x9x9x64xf32, #tpu.memory_space<vmem>>, vector<1x2x8x8x64xf32>
    %50 = vector.shape_cast %49 : vector<1x2x8x8x64xf32> to vector<2x8x8x64xf32>
    %51 = arith.truncf %50 : vector<2x8x8x64xf32> to vector<2x8x8x64xbf16>
    %52 = vector.shape_cast %51 : vector<2x8x8x64xbf16> to vector<128x64xbf16>
    %c6 = arith.constant 6 : index
    %c0_53 = arith.constant 0 : index
    %c0_54 = arith.constant 0 : index
    %53 = vector.load %arg1[%c6, %c0_53, %c0_54] : memref<9x64x128xbf16, #tpu.memory_space<vmem>>, vector<1x64x128xbf16>
    %54 = vector.shape_cast %53 : vector<1x64x128xbf16> to vector<64x128xbf16>
    %cst_55 = arith.constant dense<0.000000e+00> : vector<128x128xf32>
    %55 = tpu.matmul %52, %54, %cst_55 {dimension_numbers = #tpu.dot_dimension_numbers<[1], [0], [0], [1], [0, 0, 1, 1], [], []>} : vector<128x64xbf16>, vector<64x128xbf16>, vector<128x128xf32> -> vector<128x128xf32>
    %56 = arith.addf %48, %55 : vector<128x128xf32>
    %c1_56 = arith.constant 1 : index
    %c0_57 = arith.constant 0 : index
    %c1_58 = arith.constant 1 : index
    %c0_59 = arith.constant 0 : index
    %c0_60 = arith.constant 0 : index
    %57 = vector.load %arg0[%c1_56, %c0_57, %c1_58, %c0_59, %c0_60] : memref<4x2x9x9x64xf32, #tpu.memory_space<vmem>>, vector<1x2x8x8x64xf32>
    %58 = vector.shape_cast %57 : vector<1x2x8x8x64xf32> to vector<2x8x8x64xf32>
    %59 = arith.truncf %58 : vector<2x8x8x64xf32> to vector<2x8x8x64xbf16>
    %60 = vector.shape_cast %59 : vector<2x8x8x64xbf16> to vector<128x64xbf16>
    %c7 = arith.constant 7 : index
    %c0_61 = arith.constant 0 : index
    %c0_62 = arith.constant 0 : index
    %61 = vector.load %arg1[%c7, %c0_61, %c0_62] : memref<9x64x128xbf16, #tpu.memory_space<vmem>>, vector<1x64x128xbf16>
    %62 = vector.shape_cast %61 : vector<1x64x128xbf16> to vector<64x128xbf16>
    %cst_63 = arith.constant dense<0.000000e+00> : vector<128x128xf32>
    %63 = tpu.matmul %60, %62, %cst_63 {dimension_numbers = #tpu.dot_dimension_numbers<[1], [0], [0], [1], [0, 0, 1, 1], [], []>} : vector<128x64xbf16>, vector<64x128xbf16>, vector<128x128xf32> -> vector<128x128xf32>
    %64 = arith.addf %56, %63 : vector<128x128xf32>
    %c0_64 = arith.constant 0 : index
    %c0_65 = arith.constant 0 : index
    %c1_66 = arith.constant 1 : index
    %c1_67 = arith.constant 1 : index
    %c0_68 = arith.constant 0 : index
    %65 = vector.load %arg0[%c0_64, %c0_65, %c1_66, %c1_67, %c0_68] : memref<4x2x9x9x64xf32, #tpu.memory_space<vmem>>, vector<1x2x8x8x64xf32>
    %66 = vector.shape_cast %65 : vector<1x2x8x8x64xf32> to vector<2x8x8x64xf32>
    %67 = arith.truncf %66 : vector<2x8x8x64xf32> to vector<2x8x8x64xbf16>
    %68 = vector.shape_cast %67 : vector<2x8x8x64xbf16> to vector<128x64xbf16>
    %c8 = arith.constant 8 : index
    %c0_69 = arith.constant 0 : index
    %c0_70 = arith.constant 0 : index
    %69 = vector.load %arg1[%c8, %c0_69, %c0_70] : memref<9x64x128xbf16, #tpu.memory_space<vmem>>, vector<1x64x128xbf16>
    %70 = vector.shape_cast %69 : vector<1x64x128xbf16> to vector<64x128xbf16>
    %cst_71 = arith.constant dense<0.000000e+00> : vector<128x128xf32>
    %71 = tpu.matmul %68, %70, %cst_71 {dimension_numbers = #tpu.dot_dimension_numbers<[1], [0], [0], [1], [0, 0, 1, 1], [], []>} : vector<128x64xbf16>, vector<64x128xbf16>, vector<128x128xf32> -> vector<128x128xf32>
    %72 = arith.addf %64, %71 : vector<128x128xf32>
    %cst_72 = arith.constant dense<0.000000e+00> : vector<128xf32>
    %73 = vector.multi_reduction <add>, %72, %cst_72 [0] : vector<128x128xf32> to vector<128xf32>
    %74 = vector.shape_cast %73 : vector<128xf32> to vector<1x128xf32>
    %cst_73 = arith.constant 7.812500e-03 : f32
    %75 = vector.broadcast %cst_73 : f32 to vector<1x128xf32>
    %76 = arith.mulf %74, %75 : vector<1x128xf32>
    %77 = vector.broadcast %76 : vector<1x128xf32> to vector<128x128xf32>
    %78 = arith.subf %72, %77 : vector<128x128xf32>
    %79 = arith.mulf %78, %78 : vector<128x128xf32>
    %cst_74 = arith.constant dense<0.000000e+00> : vector<128xf32>
    %80 = vector.multi_reduction <add>, %79, %cst_74 [0] : vector<128x128xf32> to vector<128xf32>
    %81 = vector.shape_cast %80 : vector<128xf32> to vector<1x128xf32>
    %cst_75 = arith.constant 7.812500e-03 : f32
    %82 = vector.broadcast %cst_75 : f32 to vector<1x128xf32>
    %83 = arith.mulf %81, %82 : vector<1x128xf32>
    %cst_76 = arith.constant 9.99999974E-6 : f32
    %84 = vector.broadcast %cst_76 : f32 to vector<1x128xf32>
    %85 = arith.addf %83, %84 : vector<1x128xf32>
    %86 = math.rsqrt %85 : vector<1x128xf32>
    %87 = vector.broadcast %86 : vector<1x128xf32> to vector<128x128xf32>
    %88 = arith.mulf %78, %87 : vector<128x128xf32>
    %c0_77 = arith.constant 0 : index
    %c0_78 = arith.constant 0 : index
    %89 = vector.load %arg4[%c0_77, %c0_78] : memref<1x128xf32, #tpu.memory_space<vmem>>, vector<1x128xf32>
    %90 = vector.broadcast %89 : vector<1x128xf32> to vector<128x128xf32>
    %91 = arith.mulf %88, %90 : vector<128x128xf32>
    %c0_79 = arith.constant 0 : index
    %c0_80 = arith.constant 0 : index
    %92 = vector.load %arg5[%c0_79, %c0_80] : memref<1x128xf32, #tpu.memory_space<vmem>>, vector<1x128xf32>
    %93 = vector.broadcast %92 : vector<1x128xf32> to vector<128x128xf32>
    %94 = arith.addf %91, %93 : vector<128x128xf32>
    %cst_81 = arith.constant 0.000000e+00 : f32
    %95 = vector.broadcast %cst_81 : f32 to vector<128x128xf32>
    %96 = arith.maximumf %94, %95 : vector<128x128xf32>
    %cst_82 = arith.constant 0.000000e+00 : f32
    %97 = vector.broadcast %cst_82 : f32 to vector<2x10x10x128xf32>
    %c0_83 = arith.constant 0 : index
    %c0_84 = arith.constant 0 : index
    %c0_85 = arith.constant 0 : index
    %c0_86 = arith.constant 0 : index
    %98 = vector.load %arg12[%c0_83, %c0_84, %c0_85, %c0_86] : memref<2x10x10x128xf32, #tpu.memory_space<vmem>>, vector<2x10x10x128xf32>
    tpu.vector_store %arg12[%c0_83, %c0_84, %c0_85, %c0_86], %97 {strides = array<i32>} : memref<2x10x10x128xf32, #tpu.memory_space<vmem>>, vector<2x10x10x128xf32>,
    %99 = vector.shape_cast %96 : vector<128x128xf32> to vector<2x8x8x128xf32>
    %c0_87 = arith.constant 0 : index
    %c1_88 = arith.constant 1 : index
    %c1_89 = arith.constant 1 : index
    %c0_90 = arith.constant 0 : index
    %100 = vector.load %arg12[%c0_87, %c1_88, %c1_89, %c0_90] : memref<2x10x10x128xf32, #tpu.memory_space<vmem>>, vector<2x8x8x128xf32>
    tpu.vector_store %arg12[%c0_87, %c1_88, %c1_89, %c0_90], %99 {strides = array<i32>} : memref<2x10x10x128xf32, #tpu.memory_space<vmem>>, vector<2x8x8x128xf32>,
    %cst_91 = arith.constant 0.000000e+00 : f32
    %101 = vector.broadcast %cst_91 : f32 to vector<128x128xf32>
    %c0_92 = arith.constant 0 : index
    %c0_93 = arith.constant 0 : index
    %c0_94 = arith.constant 0 : index
    %c0_95 = arith.constant 0 : index
    %102 = vector.load %arg12[%c0_92, %c0_93, %c0_94, %c0_95] : memref<2x10x10x128xf32, #tpu.memory_space<vmem>>, vector<2x8x8x128xf32>
    %103 = arith.truncf %102 : vector<2x8x8x128xf32> to vector<2x8x8x128xbf16>
    %104 = vector.shape_cast %103 : vector<2x8x8x128xbf16> to vector<128x128xbf16>
    %c0_96 = arith.constant 0 : index
    %c0_97 = arith.constant 0 : index
    %c0_98 = arith.constant 0 : index
    %105 = vector.load %arg2[%c0_96, %c0_97, %c0_98] : memref<9x128x128xbf16, #tpu.memory_space<vmem>>, vector<1x128x128xbf16>
    %106 = vector.shape_cast %105 : vector<1x128x128xbf16> to vector<128x128xbf16>
    %cst_99 = arith.constant dense<0.000000e+00> : vector<128x128xf32>
    %107 = tpu.matmul %104, %106, %cst_99 {dimension_numbers = #tpu.dot_dimension_numbers<[1], [0], [0], [1], [0, 0, 1, 1], [], []>} : vector<128x128xbf16>, vector<128x128xbf16>, vector<128x128xf32> -> vector<128x128xf32>
    %108 = arith.addf %101, %107 : vector<128x128xf32>
    %c0_100 = arith.constant 0 : index
    %c0_101 = arith.constant 0 : index
    %c1_102 = arith.constant 1 : index
    %c0_103 = arith.constant 0 : index
    %109 = vector.load %arg12[%c0_100, %c0_101, %c1_102, %c0_103] : memref<2x10x10x128xf32, #tpu.memory_space<vmem>>, vector<2x8x8x128xf32>
    %110 = arith.truncf %109 : vector<2x8x8x128xf32> to vector<2x8x8x128xbf16>
    %111 = vector.shape_cast %110 : vector<2x8x8x128xbf16> to vector<128x128xbf16>
    %c1_104 = arith.constant 1 : index
    %c0_105 = arith.constant 0 : index
    %c0_106 = arith.constant 0 : index
    %112 = vector.load %arg2[%c1_104, %c0_105, %c0_106] : memref<9x128x128xbf16, #tpu.memory_space<vmem>>, vector<1x128x128xbf16>
    %113 = vector.shape_cast %112 : vector<1x128x128xbf16> to vector<128x128xbf16>
    %cst_107 = arith.constant dense<0.000000e+00> : vector<128x128xf32>
    %114 = tpu.matmul %111, %113, %cst_107 {dimension_numbers = #tpu.dot_dimension_numbers<[1], [0], [0], [1], [0, 0, 1, 1], [], []>} : vector<128x128xbf16>, vector<128x128xbf16>, vector<128x128xf32> -> vector<128x128xf32>
    %115 = arith.addf %108, %114 : vector<128x128xf32>
    %c0_108 = arith.constant 0 : index
    %c0_109 = arith.constant 0 : index
    %c2_110 = arith.constant 2 : index
    %c0_111 = arith.constant 0 : index
    %116 = vector.load %arg12[%c0_108, %c0_109, %c2_110, %c0_111] : memref<2x10x10x128xf32, #tpu.memory_space<vmem>>, vector<2x8x8x128xf32>
    %117 = arith.truncf %116 : vector<2x8x8x128xf32> to vector<2x8x8x128xbf16>
    %118 = vector.shape_cast %117 : vector<2x8x8x128xbf16> to vector<128x128xbf16>
    %c2_112 = arith.constant 2 : index
    %c0_113 = arith.constant 0 : index
    %c0_114 = arith.constant 0 : index
    %119 = vector.load %arg2[%c2_112, %c0_113, %c0_114] : memref<9x128x128xbf16, #tpu.memory_space<vmem>>, vector<1x128x128xbf16>
    %120 = vector.shape_cast %119 : vector<1x128x128xbf16> to vector<128x128xbf16>
    %cst_115 = arith.constant dense<0.000000e+00> : vector<128x128xf32>
    %121 = tpu.matmul %118, %120, %cst_115 {dimension_numbers = #tpu.dot_dimension_numbers<[1], [0], [0], [1], [0, 0, 1, 1], [], []>} : vector<128x128xbf16>, vector<128x128xbf16>, vector<128x128xf32> -> vector<128x128xf32>
    %122 = arith.addf %115, %121 : vector<128x128xf32>
    %c0_116 = arith.constant 0 : index
    %c1_117 = arith.constant 1 : index
    %c0_118 = arith.constant 0 : index
    %c0_119 = arith.constant 0 : index
    %123 = vector.load %arg12[%c0_116, %c1_117, %c0_118, %c0_119] : memref<2x10x10x128xf32, #tpu.memory_space<vmem>>, vector<2x8x8x128xf32>
    %124 = arith.truncf %123 : vector<2x8x8x128xf32> to vector<2x8x8x128xbf16>
    %125 = vector.shape_cast %124 : vector<2x8x8x128xbf16> to vector<128x128xbf16>
    %c3_120 = arith.constant 3 : index
    %c0_121 = arith.constant 0 : index
    %c0_122 = arith.constant 0 : index
    %126 = vector.load %arg2[%c3_120, %c0_121, %c0_122] : memref<9x128x128xbf16, #tpu.memory_space<vmem>>, vector<1x128x128xbf16>
    %127 = vector.shape_cast %126 : vector<1x128x128xbf16> to vector<128x128xbf16>
    %cst_123 = arith.constant dense<0.000000e+00> : vector<128x128xf32>
    %128 = tpu.matmul %125, %127, %cst_123 {dimension_numbers = #tpu.dot_dimension_numbers<[1], [0], [0], [1], [0, 0, 1, 1], [], []>} : vector<128x128xbf16>, vector<128x128xbf16>, vector<128x128xf32> -> vector<128x128xf32>
    %129 = arith.addf %122, %128 : vector<128x128xf32>
    %c0_124 = arith.constant 0 : index
    %c1_125 = arith.constant 1 : index
    %c1_126 = arith.constant 1 : index
    %c0_127 = arith.constant 0 : index
    %130 = vector.load %arg12[%c0_124, %c1_125, %c1_126, %c0_127] : memref<2x10x10x128xf32, #tpu.memory_space<vmem>>, vector<2x8x8x128xf32>
    %131 = arith.truncf %130 : vector<2x8x8x128xf32> to vector<2x8x8x128xbf16>
    %132 = vector.shape_cast %131 : vector<2x8x8x128xbf16> to vector<128x128xbf16>
    %c4_128 = arith.constant 4 : index
    %c0_129 = arith.constant 0 : index
    %c0_130 = arith.constant 0 : index
    %133 = vector.load %arg2[%c4_128, %c0_129, %c0_130] : memref<9x128x128xbf16, #tpu.memory_space<vmem>>, vector<1x128x128xbf16>
    %134 = vector.shape_cast %133 : vector<1x128x128xbf16> to vector<128x128xbf16>
    %cst_131 = arith.constant dense<0.000000e+00> : vector<128x128xf32>
    %135 = tpu.matmul %132, %134, %cst_131 {dimension_numbers = #tpu.dot_dimension_numbers<[1], [0], [0], [1], [0, 0, 1, 1], [], []>} : vector<128x128xbf16>, vector<128x128xbf16>, vector<128x128xf32> -> vector<128x128xf32>
    %136 = arith.addf %129, %135 : vector<128x128xf32>
    %c0_132 = arith.constant 0 : index
    %c1_133 = arith.constant 1 : index
    %c2_134 = arith.constant 2 : index
    %c0_135 = arith.constant 0 : index
    %137 = vector.load %arg12[%c0_132, %c1_133, %c2_134, %c0_135] : memref<2x10x10x128xf32, #tpu.memory_space<vmem>>, vector<2x8x8x128xf32>
    %138 = arith.truncf %137 : vector<2x8x8x128xf32> to vector<2x8x8x128xbf16>
    %139 = vector.shape_cast %138 : vector<2x8x8x128xbf16> to vector<128x128xbf16>
    %c5_136 = arith.constant 5 : index
    %c0_137 = arith.constant 0 : index
    %c0_138 = arith.constant 0 : index
    %140 = vector.load %arg2[%c5_136, %c0_137, %c0_138] : memref<9x128x128xbf16, #tpu.memory_space<vmem>>, vector<1x128x128xbf16>
    %141 = vector.shape_cast %140 : vector<1x128x128xbf16> to vector<128x128xbf16>
    %cst_139 = arith.constant dense<0.000000e+00> : vector<128x128xf32>
    %142 = tpu.matmul %139, %141, %cst_139 {dimension_numbers = #tpu.dot_dimension_numbers<[1], [0], [0], [1], [0, 0, 1, 1], [], []>} : vector<128x128xbf16>, vector<128x128xbf16>, vector<128x128xf32> -> vector<128x128xf32>
    %143 = arith.addf %136, %142 : vector<128x128xf32>
    %c0_140 = arith.constant 0 : index
    %c2_141 = arith.constant 2 : index
    %c0_142 = arith.constant 0 : index
    %c0_143 = arith.constant 0 : index
    %144 = vector.load %arg12[%c0_140, %c2_141, %c0_142, %c0_143] : memref<2x10x10x128xf32, #tpu.memory_space<vmem>>, vector<2x8x8x128xf32>
    %145 = arith.truncf %144 : vector<2x8x8x128xf32> to vector<2x8x8x128xbf16>
    %146 = vector.shape_cast %145 : vector<2x8x8x128xbf16> to vector<128x128xbf16>
    %c6_144 = arith.constant 6 : index
    %c0_145 = arith.constant 0 : index
    %c0_146 = arith.constant 0 : index
    %147 = vector.load %arg2[%c6_144, %c0_145, %c0_146] : memref<9x128x128xbf16, #tpu.memory_space<vmem>>, vector<1x128x128xbf16>
    %148 = vector.shape_cast %147 : vector<1x128x128xbf16> to vector<128x128xbf16>
    %cst_147 = arith.constant dense<0.000000e+00> : vector<128x128xf32>
    %149 = tpu.matmul %146, %148, %cst_147 {dimension_numbers = #tpu.dot_dimension_numbers<[1], [0], [0], [1], [0, 0, 1, 1], [], []>} : vector<128x128xbf16>, vector<128x128xbf16>, vector<128x128xf32> -> vector<128x128xf32>
    %150 = arith.addf %143, %149 : vector<128x128xf32>
    %c0_148 = arith.constant 0 : index
    %c2_149 = arith.constant 2 : index
    %c1_150 = arith.constant 1 : index
    %c0_151 = arith.constant 0 : index
    %151 = vector.load %arg12[%c0_148, %c2_149, %c1_150, %c0_151] : memref<2x10x10x128xf32, #tpu.memory_space<vmem>>, vector<2x8x8x128xf32>
    %152 = arith.truncf %151 : vector<2x8x8x128xf32> to vector<2x8x8x128xbf16>
    %153 = vector.shape_cast %152 : vector<2x8x8x128xbf16> to vector<128x128xbf16>
    %c7_152 = arith.constant 7 : index
    %c0_153 = arith.constant 0 : index
    %c0_154 = arith.constant 0 : index
    %154 = vector.load %arg2[%c7_152, %c0_153, %c0_154] : memref<9x128x128xbf16, #tpu.memory_space<vmem>>, vector<1x128x128xbf16>
    %155 = vector.shape_cast %154 : vector<1x128x128xbf16> to vector<128x128xbf16>
    %cst_155 = arith.constant dense<0.000000e+00> : vector<128x128xf32>
    %156 = tpu.matmul %153, %155, %cst_155 {dimension_numbers = #tpu.dot_dimension_numbers<[1], [0], [0], [1], [0, 0, 1, 1], [], []>} : vector<128x128xbf16>, vector<128x128xbf16>, vector<128x128xf32> -> vector<128x128xf32>
    %157 = arith.addf %150, %156 : vector<128x128xf32>
    %c0_156 = arith.constant 0 : index
    %c2_157 = arith.constant 2 : index
    %c2_158 = arith.constant 2 : index
    %c0_159 = arith.constant 0 : index
    %158 = vector.load %arg12[%c0_156, %c2_157, %c2_158, %c0_159] : memref<2x10x10x128xf32, #tpu.memory_space<vmem>>, vector<2x8x8x128xf32>
    %159 = arith.truncf %158 : vector<2x8x8x128xf32> to vector<2x8x8x128xbf16>
    %160 = vector.shape_cast %159 : vector<2x8x8x128xbf16> to vector<128x128xbf16>
    %c8_160 = arith.constant 8 : index
    %c0_161 = arith.constant 0 : index
    %c0_162 = arith.constant 0 : index
    %161 = vector.load %arg2[%c8_160, %c0_161, %c0_162] : memref<9x128x128xbf16, #tpu.memory_space<vmem>>, vector<1x128x128xbf16>
    %162 = vector.shape_cast %161 : vector<1x128x128xbf16> to vector<128x128xbf16>
    %cst_163 = arith.constant dense<0.000000e+00> : vector<128x128xf32>
    %163 = tpu.matmul %160, %162, %cst_163 {dimension_numbers = #tpu.dot_dimension_numbers<[1], [0], [0], [1], [0, 0, 1, 1], [], []>} : vector<128x128xbf16>, vector<128x128xbf16>, vector<128x128xf32> -> vector<128x128xf32>
    %164 = arith.addf %157, %163 : vector<128x128xf32>
    %cst_164 = arith.constant dense<0.000000e+00> : vector<128xf32>
    %165 = vector.multi_reduction <add>, %164, %cst_164 [0] : vector<128x128xf32> to vector<128xf32>
    %166 = vector.shape_cast %165 : vector<128xf32> to vector<1x128xf32>
    %cst_165 = arith.constant 7.812500e-03 : f32
    %167 = vector.broadcast %cst_165 : f32 to vector<1x128xf32>
    %168 = arith.mulf %166, %167 : vector<1x128xf32>
    %169 = vector.broadcast %168 : vector<1x128xf32> to vector<128x128xf32>
    %170 = arith.subf %164, %169 : vector<128x128xf32>
    %171 = arith.mulf %170, %170 : vector<128x128xf32>
    %cst_166 = arith.constant dense<0.000000e+00> : vector<128xf32>
    %172 = vector.multi_reduction <add>, %171, %cst_166 [0] : vector<128x128xf32> to vector<128xf32>
    %173 = vector.shape_cast %172 : vector<128xf32> to vector<1x128xf32>
    %cst_167 = arith.constant 7.812500e-03 : f32
    %174 = vector.broadcast %cst_167 : f32 to vector<1x128xf32>
    %175 = arith.mulf %173, %174 : vector<1x128xf32>
    %cst_168 = arith.constant 9.99999974E-6 : f32
    %176 = vector.broadcast %cst_168 : f32 to vector<1x128xf32>
    %177 = arith.addf %175, %176 : vector<1x128xf32>
    %178 = math.rsqrt %177 : vector<1x128xf32>
    %179 = vector.broadcast %178 : vector<1x128xf32> to vector<128x128xf32>
    %180 = arith.mulf %170, %179 : vector<128x128xf32>
    %c0_169 = arith.constant 0 : index
    %c0_170 = arith.constant 0 : index
    %181 = vector.load %arg6[%c0_169, %c0_170] : memref<1x128xf32, #tpu.memory_space<vmem>>, vector<1x128xf32>
    %182 = vector.broadcast %181 : vector<1x128xf32> to vector<128x128xf32>
    %183 = arith.mulf %180, %182 : vector<128x128xf32>
    %c0_171 = arith.constant 0 : index
    %c0_172 = arith.constant 0 : index
    %184 = vector.load %arg7[%c0_171, %c0_172] : memref<1x128xf32, #tpu.memory_space<vmem>>, vector<1x128xf32>
    %185 = vector.broadcast %184 : vector<1x128xf32> to vector<128x128xf32>
    %186 = arith.addf %183, %185 : vector<128x128xf32>
    %c3_173 = arith.constant 3 : index
    %c0_174 = arith.constant 0 : index
    %c0_175 = arith.constant 0 : index
    %c0_176 = arith.constant 0 : index
    %c0_177 = arith.constant 0 : index
    %187 = vector.load %arg0[%c3_173, %c0_174, %c0_175, %c0_176, %c0_177] : memref<4x2x9x9x64xf32, #tpu.memory_space<vmem>>, vector<1x2x8x8x64xf32>
    %188 = vector.shape_cast %187 : vector<1x2x8x8x64xf32> to vector<2x8x8x64xf32>
    %189 = arith.truncf %188 : vector<2x8x8x64xf32> to vector<2x8x8x64xbf16>
    %190 = vector.shape_cast %189 : vector<2x8x8x64xbf16> to vector<128x64xbf16>
    %c0_178 = arith.constant 0 : index
    %c0_179 = arith.constant 0 : index
    %191 = vector.load %arg3[%c0_178, %c0_179] : memref<64x128xbf16, #tpu.memory_space<vmem>>, vector<64x128xbf16>
    %cst_180 = arith.constant dense<0.000000e+00> : vector<128x128xf32>
    %192 = tpu.matmul %190, %191, %cst_180 {dimension_numbers = #tpu.dot_dimension_numbers<[1], [0], [0], [1], [0, 0, 1, 1], [], []>} : vector<128x64xbf16>, vector<64x128xbf16>, vector<128x128xf32> -> vector<128x128xf32>
    %cst_181 = arith.constant dense<0.000000e+00> : vector<128xf32>
    %193 = vector.multi_reduction <add>, %192, %cst_181 [0] : vector<128x128xf32> to vector<128xf32>
    %194 = vector.shape_cast %193 : vector<128xf32> to vector<1x128xf32>
    %cst_182 = arith.constant 7.812500e-03 : f32
    %195 = vector.broadcast %cst_182 : f32 to vector<1x128xf32>
    %196 = arith.mulf %194, %195 : vector<1x128xf32>
    %197 = vector.broadcast %196 : vector<1x128xf32> to vector<128x128xf32>
    %198 = arith.subf %192, %197 : vector<128x128xf32>
    %199 = arith.mulf %198, %198 : vector<128x128xf32>
    %cst_183 = arith.constant dense<0.000000e+00> : vector<128xf32>
    %200 = vector.multi_reduction <add>, %199, %cst_183 [0] : vector<128x128xf32> to vector<128xf32>
    %201 = vector.shape_cast %200 : vector<128xf32> to vector<1x128xf32>
    %cst_184 = arith.constant 7.812500e-03 : f32
    %202 = vector.broadcast %cst_184 : f32 to vector<1x128xf32>
    %203 = arith.mulf %201, %202 : vector<1x128xf32>
    %cst_185 = arith.constant 9.99999974E-6 : f32
    %204 = vector.broadcast %cst_185 : f32 to vector<1x128xf32>
    %205 = arith.addf %203, %204 : vector<1x128xf32>
    %206 = math.rsqrt %205 : vector<1x128xf32>
    %207 = vector.broadcast %206 : vector<1x128xf32> to vector<128x128xf32>
    %208 = arith.mulf %198, %207 : vector<128x128xf32>
    %c0_186 = arith.constant 0 : index
    %c0_187 = arith.constant 0 : index
    %209 = vector.load %arg8[%c0_186, %c0_187] : memref<1x128xf32, #tpu.memory_space<vmem>>, vector<1x128xf32>
    %210 = vector.broadcast %209 : vector<1x128xf32> to vector<128x128xf32>
    %211 = arith.mulf %208, %210 : vector<128x128xf32>
    %c0_188 = arith.constant 0 : index
    %c0_189 = arith.constant 0 : index
    %212 = vector.load %arg9[%c0_188, %c0_189] : memref<1x128xf32, #tpu.memory_space<vmem>>, vector<1x128xf32>
    %213 = vector.broadcast %212 : vector<1x128xf32> to vector<128x128xf32>
    %214 = arith.addf %211, %213 : vector<128x128xf32>
    %215 = arith.addf %186, %214 : vector<128x128xf32>
    %216 = vector.shape_cast %215 : vector<128x128xf32> to vector<2x8x8x128xf32>
    %c0_190 = arith.constant 0 : index
    %c0_191 = arith.constant 0 : index
    %c0_192 = arith.constant 0 : index
    %c0_193 = arith.constant 0 : index
    %217 = vector.load %arg11[%c0_190, %c0_191, %c0_192, %c0_193] : memref<2x8x8x128xf32, #tpu.memory_space<vmem>>, vector<2x8x8x128xf32>
    tpu.vector_store %arg11[%c0_190, %c0_191, %c0_192, %c0_193], %216 {strides = array<i32>} : memref<2x8x8x128xf32, #tpu.memory_space<vmem>>, vector<2x8x8x128xf32>,
    %cst_194 = arith.constant 0.000000e+00 : f32
    %218 = vector.broadcast %cst_194 : f32 to vector<128x128xf32>
    %219 = arith.maximumf %215, %218 : vector<128x128xf32>
    %220 = vector.shape_cast %219 : vector<128x128xf32> to vector<2x8x8x128xf32>
    %c0_195 = arith.constant 0 : index
    %c0_196 = arith.constant 0 : index
    %c0_197 = arith.constant 0 : index
    %c0_198 = arith.constant 0 : index
    %221 = vector.load %arg10[%c0_195, %c0_196, %c0_197, %c0_198] : memref<2x8x8x128xf32, #tpu.memory_space<vmem>>, vector<2x8x8x128xf32>
    tpu.vector_store %arg10[%c0_195, %c0_196, %c0_197, %c0_198], %220 {strides = array<i32>} : memref<2x8x8x128xf32, #tpu.memory_space<vmem>>, vector<2x8x8x128xf32>,
    return
  }
}

</mosaic_0001>

<bundles_post_ra>
// kernel: basic_block_forward.1
= control target key start
LH: loop header
LB: loop body
LE: loop exit
PB: predicated region body
PF: predicated region fallthrough
CT: control target
= control target key end

     0   :  { %17 = vsyncpa [#allocation4], 0  ;;  %vm186_vm0 = vcmask 523264   ;;  %s9086_s0 = inlined_call_operand.vmem [shape: f32[4,2,9,9,64], index: 0, kind: input, shape index: {}]   ;;  %s9087_s1 = inlined_call_operand.vmem [shape: bf16[9,64,128], index: 1, kind: input, shape index: {}]   ;;  %s9088_s2 = inlined_call_operand.vmem [shape: bf16[9,128,128], index: 2, kind: input, shape index: {}]   ;;  %s9089_s3 = inlined_call_operand.vmem [shape: bf16[64,128], index: 3, kind: input, shape index: {}]   ;;  %s9090_s4 = inlined_call_operand.vmem [shape: f32[1,128], index: 4, kind: input, shape index: {}]   ;;  %s9091_s5 = inlined_call_operand.vmem [shape: f32[1,128], index: 5, kind: input, shape index: {}]   ;;  %s9092_s6 = inlined_call_operand.vmem [shape: f32[1,128], index: 6, kind: input, shape index: {}]   ;;  %s9093_s7 = inlined_call_operand.vmem [shape: f32[1,128], index: 7, kind: input, shape index: {}]   ;;  %s9094_s8 = inlined_call_operand.vmem [shape: f32[1,128], index: 8, kind: input, shape index: {}]   ;;  %s9095_s9 = inlined_call_operand.vmem [shape: f32[1,128], index: 9, kind: input, shape index: {}]   ;;  %s9096_s10 = inlined_call_operand.hbm [shape: f32[2,8,8,128], index: 10, kind: output, shape index: {0}]   ;;  %s9097_s11 = inlined_call_operand.hbm [shape: f32[2,8,8,128], index: 11, kind: output, shape index: {1}]  }
   0x1   :  { %v7178_v0 = vld [vmem:[%s9087_s1 + $0x20] sm:$0xff]   ;;  %v7179_v1 = vld [vmem:[%s9087_s1 + $0x28] sm:$0xff]   ;;  %v7180_v2 = vld [vmem:[%s9087_s1 + $0x30] sm:$0xff]  }
   0x2   :  { %6381 = vmatprep.subr.bf16.mxu0 %v7178_v0  ;;  %v5295_v3 = vld [vmem:[%s9086_s0 + $0x120] sm:$0xff]  ;;  %v5296_v4 = vld [vmem:[%s9086_s0 + $0x130] sm:$0xff]  ;;  %v7181_v6 = vld [vmem:[%s9087_s1 + $0x38] sm:$0xff]  }
   0x3   :  { %6382 = vmatpush3.bf16.msra.mxu0 %v7178_v0  ;;  %v5965_v5 = vpack.c.bf16 %v5296_v4, %v5295_v3  ;;  %v7433_v7 = vld [vmem:[%s9086_s0 + $0x140] sm:$0xff]  ;;  %v7438_v8 = vld [vmem:[%s9086_s0 + $0x150] sm:$0xff]  ;;  %v7183_v14 = vld [vmem:[%s9087_s1 + $0x8] sm:$0xff]  }
   0x4   :  { %6383 = vmatprep.subr.bf16.mxu0 %v7179_v1  ;;  %v7182_v9 = vld [vmem:[%s9087_s1] sm:$0xff]   ;;  %v7451_v11 = vld [vmem:[%s9086_s0 + $0x170] sm:$0xff]  ;;  %v5966_v12 = vpack.c.bf16 %v7438_v8, %v7433_v7  ;;  %v7185_v22 = vld [vmem:[%s9087_s1 + $0x18] sm:$0xff]  }
   0x5   :  { %6389 = vmatprep.mubr.msk.bf16.mxu0 %vm186_vm0, %v5965_v5  ;;  %v7446_v10 = vld [vmem:[%s9086_s0 + $0x160] sm:$0xff]  ;;  %v7470_v16 = vld [vmem:[%s9086_s0 + $0x190] sm:$0xff]  ;;  %v7187_v42 = vld [vmem:[%s9087_s1 + $0x48] sm:$0xff]  }
   0x6   :  { %v5967_v13 = vpack.c.bf16 %v7451_v11, %v7446_v10  ;;  %v7464_v15 = vld [vmem:[%s9086_s0 + $0x180] sm:$0xff]  ;;  %v5303_v17 = vld [vmem:[%s9086_s0 + $0x1b0] sm:$0xff]  ;;  %v7189_v49 = vld [vmem:[%s9087_s1 + $0x58] sm:$0xff]  }
   0x7   :  { %6384 = vmatpush3.bf16.msra.mxu0 %v7179_v1  ;;  %v7478_v18 = vld [vmem:[%s9086_s0 + $0x1c0] sm:$0xff]  ;;  %v7184_v19 = vld [vmem:[%s9087_s1 + $0x10] sm:$0xff]   ;;  %v5968_v20 = vpack.c.bf16 %v7470_v16, %v7464_v15 }
   0x8   :  { %6385 = vmatprep.subr.bf16.mxu0 %v7180_v2  ;;  %v5969_v21 = vpack.c.bf16 %v7478_v18, %v5303_v17  ;;  %v7494_v23 = vld [vmem:[%s9086_s0 + $0x1d0] sm:$0xff]  ;;  %v7499_v24 = vld [vmem:[%s9086_s0 + $0x1e0] sm:$0xff] }
   0x9   :  { %v7504_v25 = vld [vmem:[%s9086_s0 + $0x1f0] sm:$0xff]  ;;  %v7509_v26 = vld [vmem:[%s9086_s0 + $0x200] sm:$0xff]  ;;  %v5970_v28 = vpack.c.bf16 %v7499_v24, %v7494_v23 }
   0xa   :  { %v7186_v27 = vld [vmem:[%s9087_s1 + $0x40] sm:$0xff]   ;;  %v5971_v29 = vpack.c.bf16 %v7509_v26, %v7504_v25  ;;  %v7523_v30 = vld [vmem:[%s9086_s0 + $0x210] sm:$0xff] }
   0xb   :  { %6386 = vmatpush3.bf16.msra.mxu0 %v7180_v2  ;;  %v7528_v31 = vld [vmem:[%s9086_s0 + $0x220] sm:$0xff]  ;;  %v7536_v33 = vld [vmem:[%s9086_s0 + $0x10] sm:$0xff] }
   0xc   :  { %6387 = vmatprep.subr.bf16.mxu0 %v7181_v6  ;;  %v40_v32 = vld [vmem:[%s9086_s0] sm:$0xff]  ;;  %v5972_v34 = vpack.c.bf16 %v7528_v31, %v7523_v30  ;;  %v7551_v37 = vld [vmem:[%s9086_s0 + $0x30] sm:$0xff] }
   0xd   :  { %v5973_v35 = vpack.c.bf16 %v7536_v33, %v40_v32  ;;  %v7546_v36 = vld [vmem:[%s9086_s0 + $0x20] sm:$0xff]  ;;  %v7561_v39 = vld [vmem:[%s9086_s0 + $0x50] sm:$0xff] }
   0xe   :  { %v7556_v38 = vld [vmem:[%s9086_s0 + $0x40] sm:$0xff]  ;;  %v5974_v40 = vpack.c.bf16 %v7551_v37, %v7546_v36  ;;  %v7580_v44 = vld [vmem:[%s9086_s0 + $0x70] sm:$0xff]  ;;  %v6013_v4 = vpack.c.bf16 %v7546_v36, %v7536_v33 }
   0xf   :  { %6388 = vmatpush3.bf16.msra.mxu0 %v7181_v6  ;;  %v5975_v41 = vpack.c.bf16 %v7561_v39, %v7556_v38  ;;  %v7574_v43 = vld [vmem:[%s9086_s0 + $0x60] sm:$0xff]  ;;  %v48_v45 = vld [vmem:[%s9086_s0 + $0x90] sm:$0xff]  ;;  %v6014_v5 = vpack.c.bf16 %v7556_v38, %v7551_v37 }
  0x10   :  { %6405 = vmatprep.subr.bf16.mxu0 %v7182_v9  ;;  %v7588_v46 = vld [vmem:[%s9086_s0 + $0xa0] sm:$0xff]  ;;  %v7188_v47 = vld [vmem:[%s9087_s1 + $0x50] sm:$0xff]   ;;  %v5976_v48 = vpack.c.bf16 %v7580_v44, %v7574_v43 }
  0x11   :  { %v5977_v50 = vpack.c.bf16 %v7588_v46, %v48_v45  ;;  %v7603_v51 = vld [vmem:[%s9086_s0 + $0xb0] sm:$0xff]  ;;  %v7608_v52 = vld [vmem:[%s9086_s0 + $0xc0] sm:$0xff] }
  0x12   :  { %6390 = vmatmul.mubr.msk.bf16.vlgmr.msra.gmra.mrb[0].mxu0 %vm186_vm0, %v5966_v12  ;;  %v7613_v53 = vld [vmem:[%s9086_s0 + $0xd0] sm:$0xff]  ;;  %v7619_v54 = vld [vmem:[%s9086_s0 + $0xe0] sm:$0xff]  ;;  %v5978_v56 = vpack.c.bf16 %v7608_v52, %v7603_v51 }
  0x13   :  { %6406 = vmatpush3.bf16.msra.mxu0 %v7182_v9  ;;  %6393 = vmatprep.mubr.msk.bf16.mxu0 %vm186_vm0, %v5967_v13  ;;  %v7190_v55 = vld [vmem:[%s9087_s1 + $0x60] sm:$0xff]   ;;  %v5979_v57 = vpack.c.bf16 %v7619_v54, %v7613_v53  ;;  %v7632_v58 = vld [vmem:[%s9086_s0 + $0xf0] sm:$0xff]  ;;  %v7191_v9 = vld [vmem:[%s9087_s1 + $0x68] sm:$0xff]  }
  0x14   :  { %6407 = vmatprep.subr.bf16.mxu0 %v7183_v14  ;;  %v7637_v59 = vld [vmem:[%s9086_s0 + $0x100] sm:$0xff]  ;;  %v7646_v61 = vld [vmem:[%s9086_s0 + $0x11] sm:$0xff] }
  0x15   :  { %v493_v60 = vld [vmem:[%s9086_s0 + $0x1] sm:$0xff]  ;;  %v5980_v62 = vpack.c.bf16 %v7637_v59, %v7632_v58  ;;  %v7659_v1 = vld [vmem:[%s9086_s0 + $0x31] sm:$0xff] }
  0x16   :  { %v5981_v63 = vpack.c.bf16 %v7646_v61, %v493_v60  ;;  %v7654_v0 = vld [vmem:[%s9086_s0 + $0x21] sm:$0xff]  ;;  %v7670_v3 = vld [vmem:[%s9086_s0 + $0x51] sm:$0xff] }
  0x17   :  { %6408 = vmatpush3.bf16.msra.mxu0 %v7183_v14  ;;  %v7665_v2 = vld [vmem:[%s9086_s0 + $0x41] sm:$0xff]  ;;  %v5982_v6 = vpack.c.bf16 %v7659_v1, %v7654_v0  ;;  %v7692_v14 = vld [vmem:[%s9086_s0 + $0x71] sm:$0xff] }
  0x18   :  { %6409 = vmatprep.subr.bf16.mxu0 %v7184_v19  ;;  %v5983_v12 = vpack.c.bf16 %v7670_v3, %v7665_v2  ;;  %v7687_v13 = vld [vmem:[%s9086_s0 + $0x61] sm:$0xff]  ;;  %v501_v17 = vld [vmem:[%s9086_s0 + $0x91] sm:$0xff] }
  0x19   :  { %v7727_v32 = vld [vmem:[%s9086_s0 + $0xd1] sm:$0xff]  ;;  %v7750_v45 = vld [vmem:[%s9086_s0 + $0x101] sm:$0xff] }
  0x1a   :  { %6394 = vmatmul.mubr.msk.bf16.gmra.mrb[4].mxu0 %vm186_vm0, %v5968_v20  ;;  %v7192_v20 = vld [vmem:[%s9087_s1 + $0x70] sm:$0xff]  }
  0x1b   :  { %6397 = vmatprep.mubr.msk.bf16.mxu0 %vm186_vm0, %v5969_v21  ;;  %6410 = vmatpush3.bf16.msra.mxu0 %v7184_v19  ;;  %v7701_v19 = vld [vmem:[%s9086_s0 + $0xa1] sm:$0xff]  ;;  %v5984_v21 = vpack.c.bf16 %v7692_v14, %v7687_v13  ;;  %v5392_v60 = vld [vmem:[%s9086_s0 + $0x290] sm:$0xff] }
  0x1c   :  { %6411 = vmatprep.subr.bf16.mxu0 %v7185_v22 }
  0x1f   :  { %6412 = vmatpush3.bf16.msra.mxu0 %v7185_v22  ;;  %v7193_v22 = vld [vmem:[%s9087_s1 + $0x78] sm:$0xff]  }
  0x20   :  { %6429 = vmatprep.subr.bf16.mxu0 %v7186_v27 }
  0x22   :  { %6398 = vmatmul.mubr.msk.bf16.gmra.mrb[8].mxu0 %vm186_vm0, %v5970_v28  ;;  %v7716_v28 = vld [vmem:[%s9086_s0 + $0xb1] sm:$0xff] }
  0x23   :  { %6401 = vmatprep.mubr.msk.bf16.mxu0 %vm186_vm0, %v5971_v29  ;;  %v7721_v29 = vld [vmem:[%s9086_s0 + $0xc1] sm:$0xff] }
  0x2a   :  { %6402 = vmatmul.mubr.msk.bf16.gmra.mrb[12].mxu0 %vm186_vm0, %v5972_v34  ;;  %v7732_v34 = vld [vmem:[%s9086_s0 + $0xe1] sm:$0xff] }
  0x2b   :  { %6413 = vmatprep.mubr.msk.bf16.mxu0 %vm186_vm0, %v5973_v35  ;;  %v7194_v35 = vld [vmem:[%s9087_s1 + $0x80] sm:$0xff]  }
  0x32   :  { %6414 = vmatmul.mubr.msk.bf16.vlgmr.msra.gmra.mrb[0].mxu0 %vm186_vm0, %v5974_v40  ;;  %v5986_v40 = vpack.c.bf16 %v7721_v29, %v7716_v28 }
  0x33   :  { %6430 = vmatpush3.bf16.msra.mxu0 %v7186_v27  ;;  %6417 = vmatprep.mubr.msk.bf16.mxu0 %vm186_vm0, %v5975_v41  ;;  %v5985_v27 = vpack.c.bf16 %v7701_v19, %v501_v17  ;;  %v5987_v41 = vpack.c.bf16 %v7732_v34, %v7727_v32  ;;  %v5395_v17 = vld [vmem:[%s9086_s0 + $0x2d0] sm:$0xff] }
  0x34   :  { %6431 = vmatprep.subr.bf16.mxu0 %v7187_v42 }
  0x37   :  { %6432 = vmatpush3.bf16.msra.mxu0 %v7187_v42  ;;  %v7745_v42 = vld [vmem:[%s9086_s0 + $0xf1] sm:$0xff] }
  0x38   :  { %6433 = vmatprep.subr.bf16.mxu0 %v7188_v47 }
  0x3a   :  { %6418 = vmatmul.mubr.msk.bf16.gmra.mrb[4].mxu0 %vm186_vm0, %v5976_v48  ;;  %v5388_v48 = vld [vmem:[%s9086_s0 + $0x250] sm:$0xff] }
  0x3b   :  { %6421 = vmatprep.mubr.msk.bf16.mxu0 %vm186_vm0, %v5977_v50  ;;  %6434 = vmatpush3.bf16.msra.mxu0 %v7188_v47  ;;  %v5387_v47 = vld [vmem:[%s9086_s0 + $0x240] sm:$0xff] }
  0x3c   :  { %6435 = vmatprep.subr.bf16.mxu0 %v7189_v49  ;;  %v5989_v50 = vpack.c.bf16 %v5388_v48, %v5387_v47 }
  0x3f   :  { %6436 = vmatpush3.bf16.msra.mxu0 %v7189_v49  ;;  %v5988_v49 = vpack.c.bf16 %v7750_v45, %v7745_v42 }
  0x40   :  { %6453 = vmatprep.subr.bf16.mxu0 %v7190_v55 }
  0x42   :  { %6422 = vmatmul.mubr.msk.bf16.gmra.mrb[8].mxu0 %vm186_vm0, %v5978_v56  ;;  %v5390_v56 = vld [vmem:[%s9086_s0 + $0x270] sm:$0xff] }
  0x43   :  { %6425 = vmatprep.mubr.msk.bf16.mxu0 %vm186_vm0, %v5979_v57  ;;  %v5391_v57 = vld [vmem:[%s9086_s0 + $0x280] sm:$0xff] }
  0x4a   :  { %6426 = vmatmul.mubr.msk.bf16.gmra.mrb[12].mxu0 %vm186_vm0, %v5980_v62 }
  0x4b   :  { %6437 = vmatprep.mubr.msk.bf16.mxu0 %vm186_vm0, %v5981_v63  ;;  %v7195_v63 = vld [vmem:[%s9087_s1 + $0x88] sm:$0xff]  }
  0x52   :  { %6438 = vmatmul.mubr.msk.bf16.vlgmr.msra.gmra.mrb[0].mxu0 %vm186_vm0, %v5982_v6  ;;  %v5991_v6 = vpack.c.bf16 %v5392_v60, %v5391_v57 }
  0x53   :  { %6454 = vmatpush3.bf16.msra.mxu0 %v7190_v55  ;;  %6441 = vmatprep.mubr.msk.bf16.mxu0 %vm186_vm0, %v5983_v12  ;;  %v5389_v55 = vld [vmem:[%s9086_s0 + $0x260] sm:$0xff]  ;;  %v5394_v12 = vld [vmem:[%s9086_s0 + $0x2b0] sm:$0xff] }
  0x54   :  { %6455 = vmatprep.subr.bf16.mxu0 %v7191_v9  ;;  %v5990_v62 = vpack.c.bf16 %v5390_v56, %v5389_v55 }
  0x57   :  { %6456 = vmatpush3.bf16.msra.mxu0 %v7191_v9  ;;  %v5393_v9 = vld [vmem:[%s9086_s0 + $0x2a0] sm:$0xff] }
  0x58   :  { %6457 = vmatprep.subr.bf16.mxu0 %v7192_v20 }
  0x5a   :  { %6442 = vmatmul.mubr.msk.bf16.gmra.mrb[4].mxu0 %vm186_vm0, %v5984_v21  ;;  %v7196_v21 = vld [vmem:[%s9087_s1 + $0x90] sm:$0xff]  }
  0x5b   :  { %6445 = vmatprep.mubr.msk.bf16.mxu0 %vm186_vm0, %v5985_v27  ;;  %6458 = vmatpush3.bf16.msra.mxu0 %v7192_v20  ;;  %v5396_v20 = vld [vmem:[%s9086_s0 + $0x2e0] sm:$0xff] }
  0x5c   :  { %6459 = vmatprep.subr.bf16.mxu0 %v7193_v22 }
  0x5f   :  { %6460 = vmatpush3.bf16.msra.mxu0 %v7193_v22  ;;  %v5992_v22 = vpack.c.bf16 %v5394_v12, %v5393_v9 }
  0x60   :  { %6477 = vmatprep.subr.bf16.mxu0 %v7194_v35 }
  0x62   :  { %6446 = vmatmul.mubr.msk.bf16.gmra.mrb[8].mxu0 %vm186_vm0, %v5986_v40 }
  0x63   :  { %6449 = vmatprep.mubr.msk.bf16.mxu0 %vm186_vm0, %v5987_v41 }
  0x6a   :  { %6450 = vmatmul.mubr.msk.bf16.gmra.mrb[12].mxu0 %vm186_vm0, %v5988_v49 }
  0x6b   :  { %6461 = vmatprep.mubr.msk.bf16.mxu0 %vm186_vm0, %v5989_v50 }
  0x72   :  { %6462 = vmatmul.mubr.msk.bf16.vlgmr.msra.gmra.mrb[0].mxu0 %vm186_vm0, %v5990_v62 }
  0x73   :  { %6478 = vmatpush3.bf16.msra.mxu0 %v7194_v35  ;;  %6465 = vmatprep.mubr.msk.bf16.mxu0 %vm186_vm0, %v5991_v6 }
  0x74   :  { %6479 = vmatprep.subr.bf16.mxu0 %v7195_v63 }
  0x75   :  { %18 = vsyncpa [#allocation6], 0  ;;  %v5993_v27 = vpack.c.bf16 %v5396_v20, %v5395_v17  ;;  %v7197_v40 = vld [vmem:[%s9087_s1 + $0x98] sm:$0xff]   ;;  %v5397_v35 = vld [vmem:[%s9086_s0 + $0x2f0] sm:$0xff]  ;;  %v6017_v37 = vpack.c.bf16 %v7603_v51, %v7588_v46  ;;  %v6019_v46 = vpack.c.bf16 %v7632_v58, %v7619_v54  ;;  %v6023_v54 = vpack.c.bf16 %v7464_v15, %v7451_v11  ;;  %s7348_s20 = smov [#allocation3]  }
  0x76   :  { %v5398_v41 = vld [vmem:[%s9086_s0 + $0x300] sm:$0xff]  ;;  %v5399_v47 = vld [vmem:[%s9086_s0 + $0x310] sm:$0xff]  ;;  %v7209_v38 = vld [vmem:[%s9087_s1 + $0xf8] sm:$0xff]   ;;  %v6025_v11 = vpack.c.bf16 %v7494_v23, %v7478_v18  ;;  %s9032_s21 = sshll.u32 %s7348_s20, 4  ;;  %s5269_s21 = int_to_ptr.vmem [resolvable:$true] %s9032_s21 }
  0x77   :  { %6480 = vmatpush3.bf16.msra.mxu0 %v7195_v63  ;;  %v5400_v48 = vld [vmem:[%s9086_s0 + $0x320] sm:$0xff]  ;;  %v5994_v50 = vpack.c.bf16 %v5398_v41, %v5397_v35  ;;  %v5401_v56 = vld [vmem:[%s9086_s0 + $0x330] sm:$0xff]  ;;  %v7211_v58 = vld [vmem:[%s9087_s1 + $0x108] sm:$0xff]  }
  0x78   :  { %6481 = vmatprep.subr.bf16.mxu0 %v7196_v21  ;;  %v7198_v49 = vld [vmem:[%s9087_s1 + $0xa0] sm:$0xff]   ;;  %v5995_v55 = vpack.c.bf16 %v5400_v48, %v5399_v47  ;;  %v5432_v62 = vld [vmem:[%s9086_s0 + $0x370] sm:$0xff]  ;;  %v7213_v15 = vld [vmem:[%s9087_s1 + $0x118] sm:$0xff]  }
  0x79   :  { %v5402_v57 = vld [vmem:[%s9086_s0 + $0x340] sm:$0xff]  ;;  %v5434_v12 = vld [vmem:[%s9086_s0 + $0x390] sm:$0xff] }
  0x7a   :  { %6466 = vmatmul.mubr.msk.bf16.gmra.mrb[4].mxu0 %vm186_vm0, %v5992_v22  ;;  %v5431_v60 = vld [vmem:[%s9086_s0 + $0x360] sm:$0xff]  ;;  %v5996_v63 = vpack.c.bf16 %v5402_v57, %v5401_v56  ;;  %v5436_v20 = vld [vmem:[%s9086_s0 + $0x3b0] sm:$0xff] }
  0x7b   :  { %6469 = vmatprep.mubr.msk.bf16.mxu0 %vm186_vm0, %v5993_v27  ;;  %6482 = vmatpush3.bf16.msra.mxu0 %v7196_v21  ;;  %v5997_v6 = vpack.c.bf16 %v5432_v62, %v5431_v60  ;;  %v5433_v9 = vld [vmem:[%s9086_s0 + $0x380] sm:$0xff]  ;;  %v7199_v27 = vld [vmem:[%s9087_s1 + $0xa8] sm:$0xff]   ;;  %v5438_v35 = vld [vmem:[%s9086_s0 + $0x3d0] sm:$0xff] }
  0x7c   :  { %6483 = vmatprep.subr.bf16.mxu0 %v7197_v40  ;;  %v5435_v17 = vld [vmem:[%s9086_s0 + $0x3a0] sm:$0xff]  ;;  %v5998_v21 = vpack.c.bf16 %v5434_v12, %v5433_v9  ;;  %v5439_v41 = vld [vmem:[%s9086_s0 + $0x3f0] sm:$0xff] }
  0x7d   :  { %v5999_v22 = vpack.c.bf16 %v5436_v20, %v5435_v17  ;;  %v5440_v47 = vld [vmem:[%s9086_s0 + $0x400] sm:$0xff]  ;;  %v7200_v48 = vld [vmem:[%s9087_s1 + $0xb0] sm:$0xff]  }
  0x7e   :  { %v5441_v56 = vld [vmem:[%s9086_s0 + $0x410] sm:$0xff]  ;;  %v5442_v57 = vld [vmem:[%s9086_s0 + $0x420] sm:$0xff] }
  0x7f   :  { %6484 = vmatpush3.bf16.msra.mxu0 %v7197_v40  ;;  %v5437_v40 = vld [vmem:[%s9086_s0 + $0x3c0] sm:$0xff]  ;;  %v5443_v60 = vld [vmem:[%s9086_s0 + $0x430] sm:$0xff] }
  0x80   :  { %6501 = vmatprep.subr.bf16.mxu0 %v7198_v49  ;;  %v5444_v62 = vld [vmem:[%s9086_s0 + $0x440] sm:$0xff]  ;;  %v5445_v12 = vld [vmem:[%s9086_s0 + $0x450] sm:$0xff] }
  0x81   :  { %v6003_v9 = vpack.c.bf16 %v5444_v62, %v5443_v60  ;;  %v5446_v17 = vld [vmem:[%s9086_s0 + $0x460] sm:$0xff]  ;;  %v7204_v62 = vld [vmem:[%s9087_s1 + $0xd0] sm:$0xff]  }
  0x82   :  { %6470 = vmatmul.mubr.msk.bf16.gmra.mrb[8].mxu0 %vm186_vm0, %v5994_v50  ;;  %v6001_v50 = vpack.c.bf16 %v5440_v47, %v5439_v41  ;;  %v5475_v20 = vld [vmem:[%s9086_s0 + $0x241] sm:$0xff]  ;;  %v5480_v47 = vld [vmem:[%s9086_s0 + $0x291] sm:$0xff] }
  0x83   :  { %6473 = vmatprep.mubr.msk.bf16.mxu0 %vm186_vm0, %v5995_v55  ;;  %v7201_v55 = vld [vmem:[%s9087_s1 + $0xb8] sm:$0xff]   ;;  %v5479_v41 = vld [vmem:[%s9086_s0 + $0x281] sm:$0xff]  ;;  %v7208_v36 = vld [vmem:[%s9087_s1 + $0xf0] sm:$0xff]  }
  0x84   :  { %v5484_v60 = vld [vmem:[%s9086_s0 + $0x2e1] sm:$0xff]  ;;  %v5534_v51 = vld [vmem:[%s9086_s0 + $0x110] sm:$0xff] }
  0x85   :  { %v5526_v33 = vld [vmem:[%s9086_s0 + $0x80] sm:$0xff]  ;;  %v5578_v18 = vld [vmem:[%s9086_s0 + $0x230] sm:$0xff] }
  0x86   :  { %v6028_v23 = vpack.c.bf16 %v5578_v18, %v7528_v31  ;;  %v6033_v31 = vpack.c.bf16 %v7716_v28, %v7701_v19  ;;  %v7217_v19 = vld [vmem:[%s9088_s2 + $0x58] sm:$0xff]   ;;  %v7218_v28 = vld [vmem:[%s9088_s2 + $0x60] sm:$0xff]  }
  0x8a   :  { %6474 = vmatmul.mubr.msk.bf16.gmra.mrb[12].mxu0 %vm186_vm0, %v5996_v63  ;;  %v7202_v63 = vld [vmem:[%s9087_s1 + $0xc0] sm:$0xff]  }
  0x8b   :  { %6485 = vmatprep.mubr.msk.bf16.mxu0 %vm186_vm0, %v5997_v6  ;;  %v6002_v6 = vpack.c.bf16 %v5442_v57, %v5441_v56  ;;  %v5482_v56 = vld [vmem:[%s9086_s0 + $0x2b1] sm:$0xff] }
  0x8c   :  { %v5483_v57 = vld [vmem:[%s9086_s0 + $0x2d1] sm:$0xff] }
  0x92   :  { %6486 = vmatmul.mubr.msk.bf16.vlgmr.msra.gmra.mrb[0].mxu0 %vm186_vm0, %v5998_v21  ;;  %v5476_v21 = vld [vmem:[%s9086_s0 + $0x251] sm:$0xff] }
  0x93   :  { %6502 = vmatpush3.bf16.msra.mxu0 %v7198_v49  ;;  %6489 = vmatprep.mubr.msk.bf16.mxu0 %vm186_vm0, %v5999_v22  ;;  %v6000_v49 = vpack.c.bf16 %v5438_v35, %v5437_v40  ;;  %v6004_v22 = vpack.c.bf16 %v5446_v17, %v5445_v12  ;;  %v5477_v40 = vld [vmem:[%s9086_s0 + $0x261] sm:$0xff]  ;;  %v5478_v35 = vld [vmem:[%s9086_s0 + $0x271] sm:$0xff] }
  0x94   :  { %6503 = vmatprep.subr.bf16.mxu0 %v7199_v27  ;;  %v5485_v12 = vld [vmem:[%s9086_s0 + $0x2f1] sm:$0xff]  ;;  %v5486_v17 = vld [vmem:[%s9086_s0 + $0x301] sm:$0xff] }
  0x97   :  { %6504 = vmatpush3.bf16.msra.mxu0 %v7199_v27  ;;  %v6005_v27 = vpack.c.bf16 %v5476_v21, %v5475_v20  ;;  %v5487_v20 = vld [vmem:[%s9086_s0 + $0x311] sm:$0xff]  ;;  %v5488_v21 = vld [vmem:[%s9086_s0 + $0x321] sm:$0xff] }
  0x98   :  { %6505 = vmatprep.subr.bf16.mxu0 %v7200_v48 }
  0x9a   :  { %6490 = vmatmul.mubr.msk.bf16.gmra.mrb[4].mxu0 %vm186_vm0, %v6000_v49  ;;  %v6007_v49 = vpack.c.bf16 %v5480_v47, %v5479_v41  ;;  %v5490_v41 = vld [vmem:[%s9086_s0 + $0x341] sm:$0xff] }
  0x9b   :  { %6493 = vmatprep.mubr.msk.bf16.mxu0 %vm186_vm0, %v6001_v50  ;;  %6506 = vmatpush3.bf16.msra.mxu0 %v7200_v48  ;;  %v6006_v48 = vpack.c.bf16 %v5478_v35, %v5477_v40  ;;  %v7203_v50 = vld [vmem:[%s9087_s1 + $0xc8] sm:$0xff]   ;;  %v6011_v40 = vpack.c.bf16 %v5488_v21, %v5487_v20  ;;  %v5489_v35 = vld [vmem:[%s9086_s0 + $0x331] sm:$0xff] }
  0x9c   :  { %6507 = vmatprep.subr.bf16.mxu0 %v7201_v55  ;;  %v6012_v47 = vpack.c.bf16 %v5490_v41, %v5489_v35 }
  0x9f   :  { %6508 = vmatpush3.bf16.msra.mxu0 %v7201_v55  ;;  %v5481_v55 = vld [vmem:[%s9086_s0 + $0x2a1] sm:$0xff] }
  0xa0   :  { %6525 = vmatprep.subr.bf16.mxu0 %v7202_v63 }
  0xa2   :  { %6494 = vmatmul.mubr.msk.bf16.gmra.mrb[8].mxu0 %vm186_vm0, %v6002_v6  ;;  %v6009_v6 = vpack.c.bf16 %v5484_v60, %v5483_v57 }
  0xa3   :  { %6497 = vmatprep.mubr.msk.bf16.mxu0 %vm186_vm0, %v6003_v9  ;;  %v7205_v9 = vld [vmem:[%s9087_s1 + $0xd8] sm:$0xff]  }
  0xaa   :  { %6498 = vmatmul.mubr.msk.bf16.gmra.mrb[12].mxu0 %vm186_vm0, %v6004_v22  ;;  %v7206_v22 = vld [vmem:[%s9087_s1 + $0xe0] sm:$0xff]  }
  0xab   :  { %6509 = vmatprep.mubr.msk.bf16.mxu0 %vm186_vm0, %v6005_v27  ;;  %v6010_v27 = vpack.c.bf16 %v5486_v17, %v5485_v12 }
  0xb2   :  { %6510 = vmatmul.mubr.msk.bf16.vlgmr.msra.gmra.mrb[0].mxu0 %vm186_vm0, %v6006_v48  ;;  %v6015_v48 = vpack.c.bf16 %v7574_v43, %v7561_v39  ;;  %v6016_v39 = vpack.c.bf16 %v5526_v33, %v7580_v44  ;;  %v7210_v43 = vld [vmem:[%s9087_s1 + $0x100] sm:$0xff]   ;;  %v6018_v44 = vpack.c.bf16 %v7613_v53, %v7608_v52  ;;  %v6022_v53 = vpack.c.bf16 %v7446_v10, %v7438_v8  ;;  %v7212_v8 = vld [vmem:[%s9087_s1 + $0x110] sm:$0xff]  }
  0xb3   :  { %6526 = vmatpush3.bf16.msra.mxu0 %v7202_v63  ;;  %6513 = vmatprep.mubr.msk.bf16.mxu0 %vm186_vm0, %v6007_v49  ;;  %v6008_v63 = vpack.c.bf16 %v5482_v56, %v5481_v55  ;;  %v7207_v49 = vld [vmem:[%s9087_s1 + $0xe8] sm:$0xff]  }
  0xb4   :  { %6527 = vmatprep.subr.bf16.mxu0 %v7203_v50 }
  0xb7   :  { %6528 = vmatpush3.bf16.msra.mxu0 %v7203_v50  ;;  %v6029_v50 = vpack.c.bf16 %v7654_v0, %v7646_v61  ;;  %v6034_v61 = vpack.c.bf16 %v7727_v32, %v7721_v29  ;;  %v6035_v0 = vpack.c.bf16 %v7745_v42, %v7732_v34  ;;  %v7219_v29 = vld [vmem:[%s9088_s2 + $0x68] sm:$0xff]   ;;  %v7346_v32 = vmov 0.0   ;;  %v7220_v34 = vld [vmem:[%s9088_s2 + $0x70] sm:$0xff]   ;;  %v7221_v42 = vld [vmem:[%s9088_s2 + $0x78] sm:$0xff]  }
  0xb8   :  { %6529 = vmatprep.subr.bf16.mxu0 %v7204_v62  ;;  %2359 = vst [vmem:[#allocation2 + $0x60] sm:$0xff] %v7346_v32  ;;  %2360 = vst [vmem:[#allocation2 + $0x68] sm:$0x3] %v7346_v32 }
  0xb9   :  { %2361 = vst [vmem:[#allocation2 + $0x70] sm:$0xff] %v7346_v32  ;;  %2362 = vst [vmem:[#allocation2 + $0x78] sm:$0x3] %v7346_v32 }
  0xba   :  { %6514 = vmatmul.mubr.msk.bf16.gmra.mrb[4].mxu0 %vm186_vm0, %v6008_v63  ;;  %2363 = vst [vmem:[#allocation2 + $0x80] sm:$0xff] %v7346_v32  ;;  %2364 = vst [vmem:[#allocation2 + $0x88] sm:$0x3] %v7346_v32 }
  0xbb   :  { %6517 = vmatprep.mubr.msk.bf16.mxu0 %vm186_vm0, %v6009_v6  ;;  %6530 = vmatpush3.bf16.msra.mxu0 %v7204_v62  ;;  %2369 = vst [vmem:[#allocation2 + $0xb0] sm:$0xff] %v7346_v32  ;;  %2370 = vst [vmem:[#allocation2 + $0xb8] sm:$0x3] %v7346_v32  ;;  %v8137_v62 = vld [vmem:[%s9088_s2] sm:$0xff]  }
  0xbc   :  { %6531 = vmatprep.subr.bf16.mxu0 %v7205_v9  ;;  %2371 = vst [vmem:[#allocation2 + $0xc0] sm:$0xff] %v7346_v32  ;;  %2372 = vst [vmem:[#allocation2 + $0xc8] sm:$0x3] %v7346_v32 }
  0xbd   :  { %2373 = vst [vmem:[#allocation2 + $0xd0] sm:$0xff] %v7346_v32  ;;  %2374 = vst [vmem:[#allocation2 + $0xd8] sm:$0x3] %v7346_v32 }
  0xbe   :  { %2375 = vst [vmem:[#allocation2 + $0xe0] sm:$0xff] %v7346_v32  ;;  %2376 = vst [vmem:[#allocation2 + $0xe8] sm:$0x3] %v7346_v32 }
  0xbf   :  { %6532 = vmatpush3.bf16.msra.mxu0 %v7205_v9  ;;  %2377 = vst [vmem:[#allocation2 + $0xf0] sm:$0xff] %v7346_v32  ;;  %2378 = vst [vmem:[#allocation2 + $0xf8] sm:$0x3] %v7346_v32 }
  0xc0   :  { %6549 = vmatprep.subr.bf16.mxu0 %v7206_v22  ;;  %2379 = vst [vmem:[#allocation2 + $0x100] sm:$0xff] %v7346_v32  ;;  %2380 = vst [vmem:[#allocation2 + $0x108] sm:$0x3] %v7346_v32 }
  0xc1   :  { %2381 = vst [vmem:[#allocation2 + $0x110] sm:$0xff] %v7346_v32  ;;  %2382 = vst [vmem:[#allocation2 + $0x118] sm:$0x3] %v7346_v32 }
  0xc2   :  { %6518 = vmatmul.mubr.msk.bf16.gmra.mrb[8].mxu0 %vm186_vm0, %v6010_v27  ;;  %2383 = vst [vmem:[#allocation2 + $0x120] sm:$0xff] %v7346_v32  ;;  %2384 = vst [vmem:[#allocation2 + $0x128] sm:$0x3] %v7346_v32 }
  0xc3   :  { %6521 = vmatprep.mubr.msk.bf16.mxu0 %vm186_vm0, %v6011_v40  ;;  %2347 = vst [vmem:[#allocation2] sm:$0xff] %v7346_v32  ;;  %2348 = vst [vmem:[#allocation2 + $0x8] sm:$0x3] %v7346_v32 }
  0xc4   :  { %2349 = vst [vmem:[#allocation2 + $0x10] sm:$0xff] %v7346_v32  ;;  %2350 = vst [vmem:[#allocation2 + $0x18] sm:$0x3] %v7346_v32 }
  0xc5   :  { %2351 = vst [vmem:[#allocation2 + $0x20] sm:$0xff] %v7346_v32  ;;  %2352 = vst [vmem:[#allocation2 + $0x28] sm:$0x3] %v7346_v32 }
  0xc6   :  { %2353 = vst [vmem:[#allocation2 + $0x30] sm:$0xff] %v7346_v32  ;;  %2354 = vst [vmem:[#allocation2 + $0x38] sm:$0x3] %v7346_v32 }
  0xc7   :  { %2355 = vst [vmem:[#allocation2 + $0x40] sm:$0xff] %v7346_v32  ;;  %2356 = vst [vmem:[#allocation2 + $0x48] sm:$0x3] %v7346_v32 }
  0xc8   :  { %2357 = vst [vmem:[#allocation2 + $0x50] sm:$0xff] %v7346_v32  ;;  %2358 = vst [vmem:[#allocation2 + $0x58] sm:$0x3] %v7346_v32 }
  0xc9   :  { %2365 = vst [vmem:[#allocation2 + $0x90] sm:$0xff] %v7346_v32  ;;  %2366 = vst [vmem:[#allocation2 + $0x98] sm:$0x3] %v7346_v32 }
  0xca   :  { %6522 = vmatmul.mubr.msk.bf16.gmra.mrb[12].mxu0 %vm186_vm0, %v6012_v47  ;;  %2367 = vst [vmem:[#allocation2 + $0xa0] sm:$0xff] %v7346_v32  ;;  %2368 = vst [vmem:[#allocation2 + $0xa8] sm:$0x3] %v7346_v32 }
  0xcb   :  { %6533 = vmatprep.mubr.msk.bf16.mxu0 %vm186_vm0, %v6013_v4  ;;  %v6020_v4 = vpack.c.bf16 %v5534_v51, %v7637_v59  ;;  %v6026_v59 = vpack.c.bf16 %v7504_v25, %v7499_v24  ;;  %v6030_v24 = vpack.c.bf16 %v7665_v2, %v7659_v1  ;;  %v6031_v25 = vpack.c.bf16 %v7687_v13, %v7670_v3  ;;  %v5622_v1 = vld [vmem:[%s9086_s0 + $0x111] sm:$0xff]  ;;  %v7214_v3 = vld [vmem:[%s9088_s2 + $0x40] sm:$0xff]   ;;  %v7215_v13 = vld [vmem:[%s9088_s2 + $0x48] sm:$0xff]  }
  0xcc   :  { %v6036_v2 = vpack.c.bf16 %v5622_v1, %v7750_v45  ;;  %6597 = vmatprep.subr.bf16.mxu1 %v7214_v3  ;;  %2385 = vst [vmem:[#allocation2 + $0x130] sm:$0xff] %v7346_v32  ;;  %2386 = vst [vmem:[#allocation2 + $0x138] sm:$0x3] %v7346_v32 }
  0xcd   :  { %6598 = vmatpush3.bf16.msra.mxu1 %v7214_v3 }
  0xce   :  { %6599 = vmatprep.subr.bf16.mxu1 %v7215_v13 }
  0xd1   :  { %6600 = vmatpush3.bf16.msra.mxu1 %v7215_v13 }
  0xd2   :  { %6534 = vmatmul.mubr.msk.bf16.vlgmr.msra.gmra.mrb[0].mxu0 %vm186_vm0, %v6014_v5  ;;  %v7296_v5 = vld [vmem:[%s9086_s0 + $0x130] sm:$0xff] }
  0xd3   :  { %6550 = vmatpush3.bf16.msra.mxu0 %v7206_v22  ;;  %6537 = vmatprep.mubr.msk.bf16.mxu0 %vm186_vm0, %v6015_v48  ;;  %v6021_v52 = vpack.c.bf16 %v7433_v7, %v7296_v5  ;;  %v5570_v7 = vld [vmem:[%s9086_s0 + $0x1a0] sm:$0xff] }
  0xd4   :  { %6551 = vmatprep.subr.bf16.mxu0 %v7207_v49  ;;  %v6024_v10 = vpack.c.bf16 %v5570_v7, %v7470_v16  ;;  %v6027_v16 = vpack.c.bf16 %v7523_v30, %v7509_v26  ;;  %v5614_v26 = vld [vmem:[%s9086_s0 + $0x81] sm:$0xff] }
  0xd5   :  { %v6032_v30 = vpack.c.bf16 %v5614_v26, %v7692_v14  ;;  %v7216_v14 = vld [vmem:[%s9088_s2 + $0x50] sm:$0xff]  }
  0xd6   :  { %6601 = vmatprep.subr.bf16.mxu1 %v7216_v14 }
  0xd7   :  { %6552 = vmatpush3.bf16.msra.mxu0 %v7207_v49  ;;  %6602 = vmatpush3.bf16.msra.mxu1 %v7216_v14 }
  0xd8   :  { %6553 = vmatprep.subr.bf16.mxu0 %v7208_v36  ;;  %6603 = vmatprep.subr.bf16.mxu1 %v7217_v19 }
  0xda   :  { %6538 = vmatmul.mubr.msk.bf16.gmra.mrb[4].mxu0 %vm186_vm0, %v6016_v39 }
  0xdb   :  { %6541 = vmatprep.mubr.msk.bf16.mxu0 %vm186_vm0, %v6017_v37  ;;  %6554 = vmatpush3.bf16.msra.mxu0 %v7208_v36 }
  0xdc   :  { %6555 = vmatprep.subr.bf16.mxu0 %v7209_v38  ;;  %6604 = vmatpush3.bf16.msra.mxu1 %v7217_v19 }
  0xdd   :  { %6605 = vmatprep.subr.bf16.mxu1 %v7218_v28 }
  0xdf   :  { %6556 = vmatpush3.bf16.msra.mxu0 %v7209_v38 }
  0xe0   :  { %6573 = vmatprep.subr.bf16.mxu0 %v7210_v43  ;;  %6606 = vmatpush3.bf16.msra.mxu1 %v7218_v28 }
  0xe1   :  { %6607 = vmatprep.subr.bf16.mxu1 %v7219_v29 }
  0xe2   :  { %6542 = vmatmul.mubr.msk.bf16.gmra.mrb[8].mxu0 %vm186_vm0, %v6018_v44 }
  0xe3   :  { %6545 = vmatprep.mubr.msk.bf16.mxu0 %vm186_vm0, %v6019_v46 }
  0xe4   :  { %6608 = vmatpush3.bf16.msra.mxu1 %v7219_v29 }
  0xe5   :  { %6609 = vmatprep.subr.bf16.mxu1 %v7220_v34 }
  0xe8   :  { %6610 = vmatpush3.bf16.msra.mxu1 %v7220_v34 }
  0xe9   :  { %6611 = vmatprep.subr.bf16.mxu1 %v7221_v42 }
  0xea   :  { %6546 = vmatmul.mubr.msk.bf16.gmra.mrb[12].mxu0 %vm186_vm0, %v6020_v4 }
  0xeb   :  { %6557 = vmatprep.mubr.msk.bf16.mxu0 %vm186_vm0, %v6021_v52 }
  0xec   :  { %6612 = vmatpush3.bf16.msra.mxu1 %v7221_v42 }
  0xed   :  { %6629 = vmatprep.subr.bf16.mxu1 %v8137_v62 }
  0xf2   :  { %6558 = vmatmul.mubr.msk.bf16.vlgmr.msra.gmra.mrb[0].mxu0 %vm186_vm0, %v6022_v53 }
  0xf3   :  { %6574 = vmatpush3.bf16.msra.mxu0 %v7210_v43  ;;  %6561 = vmatprep.mubr.msk.bf16.mxu0 %vm186_vm0, %v6023_v54 }
  0xf4   :  { %6575 = vmatprep.subr.bf16.mxu0 %v7211_v58 }
  0xf7   :  { %6576 = vmatpush3.bf16.msra.mxu0 %v7211_v58 }
  0xf8   :  { %6577 = vmatprep.subr.bf16.mxu0 %v7212_v8 }
  0xfa   :  { %6562 = vmatmul.mubr.msk.bf16.gmra.mrb[4].mxu0 %vm186_vm0, %v6024_v10 }
  0xfb   :  { %6565 = vmatprep.mubr.msk.bf16.mxu0 %vm186_vm0, %v6025_v11  ;;  %6578 = vmatpush3.bf16.msra.mxu0 %v7212_v8 }
  0xfc   :  { %6579 = vmatprep.subr.bf16.mxu0 %v7213_v15 }
  0xff   :  { %6580 = vmatpush3.bf16.msra.mxu0 %v7213_v15 }
 0x102   :  { %6566 = vmatmul.mubr.msk.bf16.gmra.mrb[8].mxu0 %vm186_vm0, %v6026_v59 }
 0x103   :  { %6569 = vmatprep.mubr.msk.bf16.mxu0 %vm186_vm0, %v6027_v16 }
 0x10a   :  { %6570 = vmatmul.mubr.msk.bf16.gmra.mrb[12].mxu0 %vm186_vm0, %v6028_v23 }
 0x10b   :  { %6581 = vmatprep.mubr.msk.bf16.mxu0 %vm186_vm0, %v6029_v50 }
 0x112   :  { %6582 = vmatmul.mubr.msk.bf16.vlgmr.msra.gmra.mrb[0].mxu0 %vm186_vm0, %v6030_v24 }
 0x113   :  { %6585 = vmatprep.mubr.msk.bf16.mxu0 %vm186_vm0, %v6031_v25 }
 0x11a   :  { %6586 = vmatmul.mubr.msk.bf16.gmra.mrb[4].mxu0 %vm186_vm0, %v6032_v30 }
 0x11b   :  { %6589 = vmatprep.mubr.msk.bf16.mxu0 %vm186_vm0, %v6033_v31 }
 0x122   :  { %6590 = vmatmul.mubr.msk.bf16.gmra.mrb[8].mxu0 %vm186_vm0, %v6034_v61 }
 0x123   :  { %6593 = vmatprep.mubr.msk.bf16.mxu0 %vm186_vm0, %v6035_v0 }
 0x12a   :  { %6594 = vmatmul.mubr.msk.bf16.gmra.mrb[12].mxu0 %vm186_vm0, %v6036_v2 }
 0x1e5   :  { %v6583_v45 = vpop.f32.mrb[0].mxu0 }
 0x1e6   :  { %v2112_v55 = vpop.f32.mrb[1].mxu0 }
 0x1e7   :  { %v6584_v56 = vpop.f32.mrb[2].mxu0 }
 0x1e8   :  { %v2115_v57 = vpop.f32.mrb[3].mxu0 }
 0x1e9   :  { %v2191_v60 = vadd.f32 %v2115_v57, %v2112_v55 }
 0x1eb   :  { %v2192_v63 = vadd.f32 %v6583_v45, %v2191_v60 }
 0x1ed   :  { %v6587_v6 = vpop.f32.mrb[4].mxu0  ;;  %v2193_v9 = vadd.f32 %v6584_v56, %v2192_v63 }
 0x1ee   :  { %v2128_v12 = vpop.f32.mrb[5].mxu0 }
 0x1ef   :  { %v2194_v17 = vadd.f32 %v2193_v9, %v2128_v12  ;;  %v6588_v20 = vpop.f32.mrb[6].mxu0 }
 0x1f0   :  { %v2131_v21 = vpop.f32.mrb[7].mxu0 }
 0x1f1   :  { %v2195_v22 = vadd.f32 %v2194_v17, %v2131_v21 }
 0x1f3   :  { %v2196_v27 = vadd.f32 %v6587_v6, %v2195_v22 }
 0x1f5   :  { %v6591_v40 = vpop.f32.mrb[8].mxu0  ;;  %v2197_v35 = vadd.f32 %v6588_v20, %v2196_v27 }
 0x1f6   :  { %v2144_v41 = vpop.f32.mrb[9].mxu0 }
 0x1f7   :  { %v2198_v47 = vadd.f32 %v2197_v35, %v2144_v41  ;;  %v6592_v48 = vpop.f32.mrb[10].mxu0 }
 0x1f8   :  { %v2147_v49 = vpop.f32.mrb[11].mxu0 }
 0x1f9   :  { %v2199_v33 = vadd.f32 %v2198_v47, %v2147_v49 }
 0x1fb   :  { %v2200_v36 = vadd.f32 %v6591_v40, %v2199_v33 }
 0x1fd   :  { %v6595_v39 = vpop.f32.mrb[12].mxu0  ;;  %v2201_v37 = vadd.f32 %v6592_v48, %v2200_v36 }
 0x1fe   :  { %v2160_v38 = vpop.f32.mrb[13].mxu0 }
 0x1ff   :  { %v2202_v43 = vadd.f32 %v2201_v37, %v2160_v38  ;;  %v6596_v44 = vpop.f32.mrb[14].mxu0 }
 0x200   :  { %v2163_v46 = vpop.f32.mrb[15].mxu0 }
 0x201   :  { %v2203_v51 = vadd.f32 %v2202_v43, %v2163_v46 }
 0x203   :  { %v2204_v4 = vadd.f32 %v6595_v39, %v2203_v51 }
 0x205   :  { %v2205_v5 = vadd.f32 %v6596_v44, %v2204_v4 }
 0x207   :  { %v2206_v52 = vrot.slane %v2205_v5, 4 }
 0x209   :  { %v2207_v53 = vadd.f32 %v2206_v52, %v2205_v5 }
 0x20b   :  { %v2208_v54 = vrot.slane %v2207_v53, 2 }
 0x20d   :  { %v2209_v58 = vadd.f32 %v2208_v54, %v2207_v53 }
 0x20f   :  { %v2210_v7 = vrot.slane %v2209_v58, 1 }
 0x211   :  { %v2211_v8 = vadd.f32 %v2210_v7, %v2209_v58 }
 0x213   :  { %v2212_v10 = vmul.f32 0.0078125, %v2211_v8 }
 0x215   :  { %v2213_v11 = vsub.f32 %v2112_v55, %v2212_v10  ;;  %v2214_v15 = vsub.f32 %v2115_v57, %v2212_v10  ;;  %v2215_v59 = vsub.f32 %v6583_v45, %v2212_v10  ;;  %v2216_v16 = vsub.f32 %v6584_v56, %v2212_v10 }
 0x216   :  { %v2217_v18 = vsub.f32 %v2128_v12, %v2212_v10  ;;  %v2218_v23 = vsub.f32 %v2131_v21, %v2212_v10  ;;  %v2219_v50 = vsub.f32 %v6587_v6, %v2212_v10  ;;  %v2220_v24 = vsub.f32 %v6588_v20, %v2212_v10 }
 0x217   :  { %v2221_v25 = vsub.f32 %v2144_v41, %v2212_v10  ;;  %v2222_v26 = vsub.f32 %v2147_v49, %v2212_v10  ;;  %v2223_v30 = vsub.f32 %v6591_v40, %v2212_v10  ;;  %v2224_v31 = vsub.f32 %v6592_v48, %v2212_v10 }
 0x218   :  { %v2225_v61 = vsub.f32 %v2160_v38, %v2212_v10  ;;  %v2226_v0 = vsub.f32 %v2163_v46, %v2212_v10  ;;  %v2227_v1 = vsub.f32 %v6595_v39, %v2212_v10  ;;  %v2228_v2 = vsub.f32 %v6596_v44, %v2212_v10 }
 0x219   :  { %v2229_v3 = vmul.f32 %v2213_v11, %v2213_v11  ;;  %v2230_v13 = vmul.f32 %v2214_v15, %v2214_v15  ;;  %v2231_v14 = vmul.f32 %v2215_v59, %v2215_v59  ;;  %v2232_v28 = vmul.f32 %v2216_v16, %v2216_v16 }
 0x21a   :  { %v2233_v34 = vmul.f32 %v2217_v18, %v2217_v18  ;;  %v2234_v45 = vmul.f32 %v2218_v23, %v2218_v23  ;;  %v2235_v56 = vmul.f32 %v2219_v50, %v2219_v50  ;;  %v2236_v60 = vmul.f32 %v2220_v24, %v2220_v24 }
 0x21b   :  { %v2245_v19 = vadd.f32 %v2230_v13, %v2229_v3  ;;  %v2237_v6 = vmul.f32 %v2221_v25, %v2221_v25  ;;  %v2238_v12 = vmul.f32 %v2222_v26, %v2222_v26  ;;  %v2239_v20 = vmul.f32 %v2223_v30, %v2223_v30 }
 0x21c   :  { %v2240_v22 = vmul.f32 %v2224_v31, %v2224_v31  ;;  %v2241_v40 = vmul.f32 %v2225_v61, %v2225_v61  ;;  %v2242_v41 = vmul.f32 %v2226_v0, %v2226_v0  ;;  %v2243_v48 = vmul.f32 %v2227_v1, %v2227_v1 }
 0x21d   :  { %v2246_v29 = vadd.f32 %v2245_v19, %v2231_v14  ;;  %v2244_v33 = vmul.f32 %v2228_v2, %v2228_v2  ;;  %v5651_v14 = vld [vmem:[%s9090_s4] ss:$0 sm:$0xff] }
 0x21f   :  { %v2247_v42 = vadd.f32 %v2246_v29, %v2232_v28 }
 0x221   :  { %v2248_v55 = vadd.f32 %v2247_v42, %v2233_v34 }
 0x223   :  { %v2249_v57 = vadd.f32 %v2248_v55, %v2234_v45 }
 0x225   :  { %v2250_v63 = vadd.f32 %v2249_v57, %v2235_v56  ;;  %v5652_v57 = vld [vmem:[%s9091_s5] ss:$0 sm:$0xff] }
 0x227   :  { %v2251_v9 = vadd.f32 %v2250_v63, %v2236_v60 }
 0x229   :  { %v2252_v17 = vadd.f32 %v2251_v9, %v2237_v6 }
 0x22b   :  { %v2253_v21 = vadd.f32 %v2252_v17, %v2238_v12 }
 0x22d   :  { %v2254_v27 = vadd.f32 %v2253_v21, %v2239_v20 }
 0x22f   :  { %v2255_v35 = vadd.f32 %v2254_v27, %v2240_v22 }
 0x231   :  { %v2256_v47 = vadd.f32 %v2255_v35, %v2241_v40 }
 0x233   :  { %v2257_v49 = vadd.f32 %v2256_v47, %v2242_v41 }
 0x235   :  { %v2258_v36 = vadd.f32 %v2257_v49, %v2243_v48 }
 0x237   :  { %v2259_v39 = vadd.f32 %v2258_v36, %v2244_v33 }
 0x239   :  { %v2260_v37 = vrot.slane %v2259_v39, 4 }
 0x23b   :  { %v2261_v38 = vadd.f32 %v2260_v37, %v2259_v39 }
 0x23d   :  { %v2262_v43 = vrot.slane %v2261_v38, 2 }
 0x23f   :  { %v2263_v44 = vadd.f32 %v2262_v43, %v2261_v38 }
 0x241   :  { %v2264_v46 = vrot.slane %v2263_v44, 1 }
 0x243   :  { %v2265_v51 = vadd.f32 %v2264_v46, %v2263_v44 }
 0x245   :  { %v2266_v4 = vmul.f32 0.0078125, %v2265_v51 }
 0x247   :  { %v2267_v5 = vadd.f32 1e-05, %v2266_v4 }
 0x249   :  { %7290 = vrsqrt.f32 %v2267_v5 }
 0x253   :  { %v7291_v52 = vpop.eup %7290 }
 0x254   :  { %v2269_v53 = vmul.f32 %v7291_v52, %v2213_v11  ;;  %v2270_v54 = vmul.f32 %v7291_v52, %v2214_v15  ;;  %v2271_v58 = vmul.f32 %v7291_v52, %v2215_v59  ;;  %v2272_v7 = vmul.f32 %v7291_v52, %v2216_v16 }
 0x255   :  { %v2273_v8 = vmul.f32 %v7291_v52, %v2217_v18  ;;  %v2274_v10 = vmul.f32 %v7291_v52, %v2218_v23  ;;  %v2275_v3 = vmul.f32 %v7291_v52, %v2219_v50  ;;  %v2276_v13 = vmul.f32 %v7291_v52, %v2220_v24 }
 0x256   :  { %v2277_v19 = vmul.f32 %v7291_v52, %v2221_v25  ;;  %v2278_v28 = vmul.f32 %v7291_v52, %v2222_v26  ;;  %v2279_v29 = vmul.f32 %v7291_v52, %v2223_v30  ;;  %v2280_v34 = vmul.f32 %v7291_v52, %v2224_v31 }
 0x257   :  { %v2281_v42 = vmul.f32 %v7291_v52, %v2225_v61  ;;  %v2282_v45 = vmul.f32 %v7291_v52, %v2226_v0  ;;  %v2283_v55 = vmul.f32 %v7291_v52, %v2227_v1  ;;  %v2284_v56 = vmul.f32 %v7291_v52, %v2228_v2 }
 0x258   :  { %v2292_v11 = vmul.f32 %v5651_v14, %v2269_v53  ;;  %v2293_v15 = vmul.f32 %v5651_v14, %v2270_v54  ;;  %v2294_v59 = vmul.f32 %v5651_v14, %v2271_v58  ;;  %v2295_v16 = vmul.f32 %v5651_v14, %v2272_v7 }
 0x259   :  { %v2296_v18 = vmul.f32 %v5651_v14, %v2273_v8  ;;  %v2297_v23 = vmul.f32 %v5651_v14, %v2274_v10  ;;  %v2298_v50 = vmul.f32 %v5651_v14, %v2275_v3  ;;  %v2299_v24 = vmul.f32 %v5651_v14, %v2276_v13  ;;  %v2452_v8 = vld [vmem:[#allocation2 + $0x1] sm:$0xff] }
 0x25a   :  { %v2300_v25 = vmul.f32 %v5651_v14, %v2277_v19  ;;  %v2301_v26 = vmul.f32 %v5651_v14, %v2278_v28  ;;  %v2302_v30 = vmul.f32 %v5651_v14, %v2279_v29  ;;  %v2303_v31 = vmul.f32 %v5651_v14, %v2280_v34 }
 0x25b   :  { %v2304_v61 = vmul.f32 %v5651_v14, %v2281_v42  ;;  %v2305_v0 = vmul.f32 %v5651_v14, %v2282_v45  ;;  %v2306_v1 = vmul.f32 %v5651_v14, %v2283_v55  ;;  %v2307_v2 = vmul.f32 %v5651_v14, %v2284_v56  ;;  %v7247_v55 = vld [vmem:[%s9088_s2 + $0x108] sm:$0xff]  }
 0x25c   :  { %v2316_v60 = vadd.f32 %v5652_v57, %v2293_v15  ;;  %v2317_v63 = vadd.f32 %v5652_v57, %v2294_v59  ;;  %v2318_v6 = vadd.f32 %v5652_v57, %v2295_v16  ;;  %v2319_v9 = vadd.f32 %v5652_v57, %v2296_v18  ;;  %v7223_v16 = vld [vmem:[%s9088_s2 + $0x8] sm:$0xff]   ;;  %v7224_v18 = vld [vmem:[%s9088_s2 + $0x10] sm:$0xff]  }
 0x25d   :  { %v2320_v12 = vadd.f32 %v5652_v57, %v2297_v23  ;;  %v2321_v17 = vadd.f32 %v5652_v57, %v2298_v50  ;;  %v2322_v20 = vadd.f32 %v5652_v57, %v2299_v24  ;;  %v2323_v21 = vadd.f32 %v5652_v57, %v2300_v25  ;;  %v2460_v25 = vld [vmem:[#allocation2 + $0xa1] sm:$0xff] }
 0x25e   :  { %v2324_v22 = vadd.f32 %v5652_v57, %v2301_v26  ;;  %v2325_v27 = vadd.f32 %v5652_v57, %v2302_v30  ;;  %v2326_v40 = vadd.f32 %v5652_v57, %v2303_v31  ;;  %v2327_v35 = vadd.f32 %v5652_v57, %v2304_v61  ;;  %v7225_v31 = vld [vmem:[%s9088_s2 + $0x18] sm:$0xff]  }
 0x25f   :  { %v2328_v41 = vadd.f32 %v5652_v57, %v2305_v0  ;;  %v2329_v47 = vadd.f32 %v5652_v57, %v2306_v1  ;;  %v2330_v48 = vadd.f32 %v5652_v57, %v2307_v2  ;;  %v8146_v49 = vmax.f32 %v2316_v60, 0.0  ;;  %v7245_v1 = vld [vmem:[%s9088_s2 + $0xf8] sm:$0xff]  }
 0x260   :  { %v8148_v33 = vmax.f32 %v2317_v63, 0.0  ;;  %v8150_v36 = vmax.f32 %v2318_v6, 0.0  ;;  %v8152_v39 = vmax.f32 %v2319_v9, 0.0  ;;  %v8154_v37 = vmax.f32 %v2320_v12, 0.0  ;;  %v7241_v9 = vld [vmem:[%s9088_s2 + $0xd8] sm:$0xff]  }
 0x261   :  { %v8156_v38 = vmax.f32 %v2321_v17, 0.0  ;;  %v2338_v43 = vmax.f32 %v2322_v20, 0.0  ;;  %v8158_v44 = vmax.f32 %v2323_v21, 0.0  ;;  %v8160_v46 = vmax.f32 %v2324_v22, 0.0  ;;  %2389 = vst [vmem:[#allocation2 + $0x21] sm:$0xff] %v8146_v49  ;;  %v7226_v22 = vld [vmem:[%s9088_s2 + $0x20] sm:$0xff]  }
 0x262   :  { %v8163_v51 = vmax.f32 %v2325_v27, 0.0  ;;  %v8165_v4 = vmax.f32 %v2326_v40, 0.0  ;;  %v8167_v5 = vmax.f32 %v2327_v35, 0.0  ;;  %v8169_v52 = vmax.f32 %v2328_v41, 0.0  ;;  %2393 = vst [vmem:[#allocation2 + $0x61] sm:$0xff] %v8154_v37  ;;  %2390 = vst [vmem:[#allocation2 + $0x31] sm:$0xff] %v8148_v33 }
 0x263   :  { %2391 = vst [vmem:[#allocation2 + $0x41] sm:$0xff] %v8150_v36  ;;  %2392 = vst [vmem:[#allocation2 + $0x51] sm:$0xff] %v8152_v39  ;;  %v8175_v53 = vmax.f32 %v2329_v47, 0.0  ;;  %v2346_v54 = vmax.f32 %v2330_v48, 0.0  ;;  %v2315_v58 = vadd.f32 %v5652_v57, %v2292_v11  ;;  %v6038_v7 = vpack.c.bf16 %v8148_v33, %v8146_v49  ;;  %v7227_v27 = vld [vmem:[%s9088_s2 + $0x28] sm:$0xff]   ;;  %v7228_v40 = vld [vmem:[%s9088_s2 + $0x30] sm:$0xff]  }
 0x264   :  { %2394 = vst [vmem:[#allocation2 + $0x71] sm:$0xff] %v8156_v38  ;;  %2395 = vst [vmem:[#allocation2 + $0x81] sm:$0xff] %v2338_v43  ;;  %v6039_v10 = vpack.c.bf16 %v8152_v39, %v8150_v36  ;;  %v6040_v3 = vpack.c.bf16 %v8156_v38, %v8154_v37  ;;  %v6042_v13 = vpack.c.bf16 %v8163_v51, %v8160_v46  ;;  %v7229_v41 = vld [vmem:[%s9088_s2 + $0x38] sm:$0xff]   ;;  %v7230_v48 = vld [vmem:[%s9088_s2 + $0x80] sm:$0xff]  }
 0x265   :  { %2396 = vst [vmem:[#allocation2 + $0xb1] sm:$0xff] %v8158_v44  ;;  %2397 = vst [vmem:[#allocation2 + $0xc1] sm:$0xff] %v8160_v46  ;;  %v8193_v14 = vmax.f32 %v2315_v58, 0.0  ;;  %v6043_v19 = vpack.c.bf16 %v8167_v5, %v8165_v4  ;;  %v6044_v28 = vpack.c.bf16 %v8175_v53, %v8169_v52  ;;  %v6070_v29 = vpack.c.bf16 %v8150_v36, %v8148_v33  ;;  %v7239_v21 = vld [vmem:[%s9088_s2 + $0xc8] sm:$0xff]   ;;  %v5929_v33 = vld [vmem:[%s9086_s0 + $0x380] sm:$0xff] }
 0x266   :  { %2398 = vst [vmem:[#allocation2 + $0xd1] sm:$0xff] %v8163_v51  ;;  %2399 = vst [vmem:[#allocation2 + $0xe1] sm:$0xff] %v8165_v4  ;;  %v6071_v34 = vpack.c.bf16 %v8154_v37, %v8152_v39  ;;  %v8204_v42 = vpack.c.bf16 %v2338_v43, %v8156_v38  ;;  %v6073_v45 = vpack.c.bf16 %v8160_v46, %v8158_v44  ;;  %v7256_v36 = vld [vmem:[%s9088_s2 + $0x150] sm:$0xff]  }
 0x267   :  { %2400 = vst [vmem:[#allocation2 + $0xf1] sm:$0xff] %v8167_v5  ;;  %2401 = vst [vmem:[#allocation2 + $0x101] sm:$0xff] %v8169_v52  ;;  %v6037_v56 = vpack.c.bf16 %v8193_v14, %v2452_v8  ;;  %v6069_v11 = vpack.c.bf16 %v8146_v49, %v8193_v14  ;;  %v8217_v59 = vpack.c.bf16 %v2346_v54, %v8175_v53  ;;  %v7255_v49 = vld [vmem:[%s9088_s2 + $0x148] sm:$0xff]   ;;  %v5930_v37 = vld [vmem:[%s9086_s0 + $0x390] sm:$0xff] }
 0x268   :  { %2402 = vst [vmem:[#allocation2 + $0x111] sm:$0xff] %v8175_v53  ;;  %2403 = vst [vmem:[#allocation2 + $0x121] sm:$0xff] %v2346_v54  ;;  %v8226_v23 = vld [vmem:[#allocation2 + $0x22] sm:$0xff]  ;;  %v6041_v12 = vpack.c.bf16 %v8158_v44, %v2460_v25  ;;  %v5934_v46 = vld [vmem:[%s9086_s0 + $0x3d0] sm:$0xff] }
 0x269   :  { %2388 = vst [vmem:[#allocation2 + $0x11] sm:$0xff] %v8193_v14  ;;  %6613 = vmatprep.mubr.bf16.mxu1 %v6037_v56  ;;  %v8228_v50 = vld [vmem:[#allocation2 + $0x32] sm:$0xff]  ;;  %v8236_v30 = vld [vmem:[#allocation2 + $0x62] sm:$0xff] }
 0x26a   :  { %6614 = vmatmul.mubr.bf16.vlgmr.msra.gmra.mrb[0].mxu1 %v6038_v7  ;;  %v8230_v24 = vld [vmem:[#allocation2 + $0x42] sm:$0xff]  ;;  %v8232_v57 = vld [vmem:[#allocation2 + $0x52] sm:$0xff] }
 0x26b   :  { %6617 = vmatprep.mubr.bf16.mxu1 %v6039_v10  ;;  %6630 = vmatpush3.bf16.msra.mxu1 %v8137_v62  ;;  %v8285_v38 = vld [vmem:[#allocation2 + $0x20] sm:$0xff]  ;;  %v8287_v43 = vld [vmem:[#allocation2 + $0x30] sm:$0xff]  ;;  %v7231_v7 = vld [vmem:[%s9088_s2 + $0x88] sm:$0xff]  }
 0x26c   :  { %6631 = vmatprep.subr.bf16.mxu1 %v7223_v16  ;;  %v8243_v61 = vld [vmem:[#allocation2 + $0xb2] sm:$0xff]  ;;  %v8245_v0 = vld [vmem:[#allocation2 + $0xc2] sm:$0xff]  ;;  %v8295_v58 = vpack.c.bf16 %v8287_v43, %v8285_v38 }
 0x26d   :  { %v8249_v2 = vld [vmem:[#allocation2 + $0xd2] sm:$0xff]  ;;  %v8251_v60 = vld [vmem:[#allocation2 + $0xe2] sm:$0xff] }
 0x26e   :  { %v8253_v63 = vld [vmem:[#allocation2 + $0xf2] sm:$0xff]  ;;  %v8260_v17 = vld [vmem:[#allocation2 + $0x102] sm:$0xff]  ;;  %v8400_v6 = vpack.c.bf16 %v8249_v2, %v8245_v0 }
 0x26f   :  { %6632 = vmatpush3.bf16.msra.mxu1 %v7223_v16  ;;  %v8289_v53 = vld [vmem:[#allocation2 + $0x40] sm:$0xff]  ;;  %v8291_v54 = vld [vmem:[#allocation2 + $0x50] sm:$0xff]  ;;  %v7233_v56 = vld [vmem:[%s9088_s2 + $0x98] sm:$0xff]  }
 0x270   :  { %v8234_v26 = vld [vmem:[#allocation2 + $0x12] sm:$0xff]  ;;  %6633 = vmatprep.subr.bf16.mxu1 %v7224_v18  ;;  %v8302_v8 = vpack.c.bf16 %v8291_v54, %v8289_v53  ;;  %v8328_v25 = vld [vmem:[#allocation2 + $0xc0] sm:$0xff]  ;;  %v7243_v62 = vld [vmem:[%s9088_s2 + $0xe8] sm:$0xff]   ;;  %v6062_v15 = vpack.c.bf16 %v8289_v53, %v8287_v43 }
 0x271   :  { %v8275_v35 = vld [vmem:[#allocation2 + $0x10] sm:$0xff]  ;;  %v7249_v53 = vld [vmem:[%s9088_s2 + $0x118] sm:$0xff]   ;;  %v5927_v14 = vld [vmem:[%s9086_s0 + $0x360] sm:$0xff] }
 0x272   :  { %6618 = vmatmul.mubr.bf16.gmra.mrb[4].mxu1 %v6040_v3  ;;  %v6045_v47 = vpack.c.bf16 %v8275_v35, %v7346_v32  ;;  %v7232_v10 = vld [vmem:[%s9088_s2 + $0x90] sm:$0xff]   ;;  %v8309_v3 = vld [vmem:[#allocation2 + $0x60] sm:$0xff] }
 0x273   :  { %6621 = vmatprep.mubr.bf16.mxu1 %v6041_v12  ;;  %6634 = vmatpush3.bf16.msra.mxu1 %v7224_v18  ;;  %v7234_v18 = vld [vmem:[%s9088_s2 + $0xa0] sm:$0xff]  }
 0x274   :  { %6635 = vmatprep.subr.bf16.mxu1 %v7225_v31  ;;  %v8332_v12 = vld [vmem:[#allocation2 + $0xe0] sm:$0xff] }
 0x277   :  { %6636 = vmatpush3.bf16.msra.mxu1 %v7225_v31  ;;  %v8330_v31 = vld [vmem:[#allocation2 + $0xd0] sm:$0xff] }
 0x278   :  { %6637 = vmatprep.subr.bf16.mxu1 %v7226_v22 }
 0x27a   :  { %6622 = vmatmul.mubr.bf16.gmra.mrb[8].mxu1 %v6042_v13  ;;  %v8311_v13 = vld [vmem:[#allocation2 + $0x70] sm:$0xff] }
 0x27b   :  { %6625 = vmatprep.mubr.bf16.mxu1 %v6043_v19  ;;  %6638 = vmatpush3.bf16.msra.mxu1 %v7226_v22  ;;  %v8313_v19 = vld [vmem:[#allocation2 + $0xb0] sm:$0xff] }
 0x27c   :  { %6639 = vmatprep.subr.bf16.mxu1 %v7227_v27  ;;  %v6049_v16 = vpack.c.bf16 %v8313_v19, %v7346_v32  ;;  %v8334_v22 = vld [vmem:[#allocation2 + $0xf0] sm:$0xff]  ;;  %v8338_v32 = vpack.c.bf16 %v8330_v31, %v8328_v25 }
 0x27f   :  { %6640 = vmatpush3.bf16.msra.mxu1 %v7227_v27  ;;  %v7235_v27 = vld [vmem:[%s9088_s2 + $0xa8] sm:$0xff]  }
 0x280   :  { %6641 = vmatprep.subr.bf16.mxu1 %v7228_v40 }
 0x282   :  { %6626 = vmatmul.mubr.bf16.gmra.mrb[12].mxu1 %v6044_v28  ;;  %v8317_v28 = vpack.c.bf16 %v8311_v13, %v8309_v3 }
 0x283   :  { %6642 = vmatpush3.bf16.msra.mxu1 %v7228_v40  ;;  %6645 = vmatprep.mubr.bf16.mxu1 %v6045_v47  ;;  %v8345_v40 = vpack.c.bf16 %v8334_v22, %v8332_v12  ;;  %v8352_v47 = vld [vmem:[#allocation2 + $0x100] sm:$0xff] }
 0x284   :  { %6643 = vmatprep.subr.bf16.mxu1 %v7229_v41 }
 0x287   :  { %6644 = vmatpush3.bf16.msra.mxu1 %v7229_v41  ;;  %v7236_v41 = vld [vmem:[%s9088_s2 + $0xb0] sm:$0xff]  }
 0x288   :  { %6661 = vmatprep.subr.bf16.mxu1 %v7230_v48 }
 0x28a   :  { %6646 = vmatmul.mubr.bf16.vlgmr.msra.gmra.mrb[0].mxu1 %v8295_v58 }
 0x28b   :  { %6649 = vmatprep.mubr.bf16.mxu1 %v8302_v8  ;;  %6662 = vmatpush3.bf16.msra.mxu1 %v7230_v48  ;;  %v8354_v48 = vld [vmem:[#allocation2 + $0x110] sm:$0xff] }
 0x28c   :  { %6663 = vmatprep.subr.bf16.mxu1 %v7231_v7 }
 0x28f   :  { %6664 = vmatpush3.bf16.msra.mxu1 %v7231_v7  ;;  %v2887_v7 = vld [vmem:[#allocation2 + $0x2] sm:$0xff] }
 0x290   :  { %6665 = vmatprep.subr.bf16.mxu1 %v7232_v10 }
 0x292   :  { %6650 = vmatmul.mubr.bf16.gmra.mrb[4].mxu1 %v8317_v28 }
 0x293   :  { %6653 = vmatprep.mubr.bf16.mxu1 %v6049_v16  ;;  %6666 = vmatpush3.bf16.msra.mxu1 %v7232_v10  ;;  %v8358_v10 = vpack.c.bf16 %v8354_v48, %v8352_v47  ;;  %v6053_v16 = vpack.c.bf16 %v8234_v26, %v2887_v7  ;;  %v8377_v7 = vpack.c.bf16 %v8232_v57, %v8230_v24 }
 0x294   :  { %6667 = vmatprep.subr.bf16.mxu1 %v7233_v56 }
 0x297   :  { %6668 = vmatpush3.bf16.msra.mxu1 %v7233_v56  ;;  %v7237_v56 = vld [vmem:[%s9088_s2 + $0xb8] sm:$0xff]  }
 0x298   :  { %6669 = vmatprep.subr.bf16.mxu1 %v7234_v18 }
 0x29a   :  { %6654 = vmatmul.mubr.bf16.gmra.mrb[8].mxu1 %v8338_v32 }
 0x29b   :  { %6657 = vmatprep.mubr.bf16.mxu1 %v8345_v40  ;;  %6670 = vmatpush3.bf16.msra.mxu1 %v7234_v18  ;;  %v7238_v18 = vld [vmem:[%s9088_s2 + $0xc0] sm:$0xff]  }
 0x29c   :  { %6671 = vmatprep.subr.bf16.mxu1 %v7235_v27 }
 0x29f   :  { %6672 = vmatpush3.bf16.msra.mxu1 %v7235_v27  ;;  %v8370_v27 = vpack.c.bf16 %v8228_v50, %v8226_v23 }
 0x2a0   :  { %6673 = vmatprep.subr.bf16.mxu1 %v7236_v41 }
 0x2a2   :  { %6658 = vmatmul.mubr.bf16.gmra.mrb[12].mxu1 %v8358_v10 }
 0x2a3   :  { %6674 = vmatpush3.bf16.msra.mxu1 %v7236_v41  ;;  %6677 = vmatprep.mubr.bf16.mxu1 %v6053_v16  ;;  %v7240_v41 = vld [vmem:[%s9088_s2 + $0xd0] sm:$0xff]   ;;  %v2895_v16 = vld [vmem:[#allocation2 + $0xa2] sm:$0xff] }
 0x2a4   :  { %6675 = vmatprep.subr.bf16.mxu1 %v7237_v56 }
 0x2a7   :  { %6676 = vmatpush3.bf16.msra.mxu1 %v7237_v56  ;;  %v8384_v56 = vld [vmem:[#allocation2 + $0x72] sm:$0xff] }
 0x2a8   :  { %6693 = vmatprep.subr.bf16.mxu1 %v7238_v18  ;;  %v8388_v20 = vpack.c.bf16 %v8384_v56, %v8236_v30 }
 0x2aa   :  { %6678 = vmatmul.mubr.bf16.vlgmr.msra.gmra.mrb[0].mxu1 %v8370_v27 }
 0x2ab   :  { %6681 = vmatprep.mubr.bf16.mxu1 %v8377_v7  ;;  %6694 = vmatpush3.bf16.msra.mxu1 %v7238_v18  ;;  %v6057_v18 = vpack.c.bf16 %v8243_v61, %v2895_v16  ;;  %v8407_v16 = vpack.c.bf16 %v8253_v63, %v8251_v60 }
 0x2ac   :  { %6695 = vmatprep.subr.bf16.mxu1 %v7239_v21 }
 0x2af   :  { %6696 = vmatpush3.bf16.msra.mxu1 %v7239_v21  ;;  %v7242_v21 = vld [vmem:[%s9088_s2 + $0xe0] sm:$0xff]  }
 0x2b0   :  { %6697 = vmatprep.subr.bf16.mxu1 %v7240_v41 }
 0x2b2   :  { %6682 = vmatmul.mubr.bf16.gmra.mrb[4].mxu1 %v8388_v20 }
 0x2b3   :  { %6685 = vmatprep.mubr.bf16.mxu1 %v6057_v18  ;;  %6698 = vmatpush3.bf16.msra.mxu1 %v7240_v41  ;;  %v8414_v41 = vld [vmem:[#allocation2 + $0x112] sm:$0xff] }
 0x2b4   :  { %6699 = vmatprep.subr.bf16.mxu1 %v7241_v9  ;;  %v8418_v18 = vpack.c.bf16 %v8414_v41, %v8260_v17 }
 0x2b7   :  { %6700 = vmatpush3.bf16.msra.mxu1 %v7241_v9  ;;  %v7244_v9 = vld [vmem:[%s9088_s2 + $0xf0] sm:$0xff]  }
 0x2b8   :  { %6701 = vmatprep.subr.bf16.mxu1 %v7242_v21 }
 0x2ba   :  { %6686 = vmatmul.mubr.bf16.gmra.mrb[8].mxu1 %v8400_v6 }
 0x2bb   :  { %6689 = vmatprep.mubr.bf16.mxu1 %v8407_v16  ;;  %6702 = vmatpush3.bf16.msra.mxu1 %v7242_v21  ;;  %v6061_v21 = vpack.c.bf16 %v8285_v38, %v8275_v35  ;;  %v6063_v35 = vpack.c.bf16 %v8309_v3, %v8291_v54  ;;  %v7248_v38 = vld [vmem:[%s9088_s2 + $0x110] sm:$0xff]   ;;  %v8451_v54 = vld [vmem:[%s9089_s3] sm:$0xff]   ;;  %v6066_v3 = vpack.c.bf16 %v8332_v12, %v8330_v31 }
 0x2bc   :  { %6703 = vmatprep.subr.bf16.mxu1 %v7243_v62  ;;  %6885 = vmatprep.subr.bf16.mxu0 %v8451_v54  ;;  %v7252_v31 = vld [vmem:[%s9088_s2 + $0x130] sm:$0xff]   ;;  %v8474_v12 = vld [vmem:[#allocation2 + $0x120] sm:$0xff] }
 0x2bd   :  { %6886 = vmatpush3.bf16.msra.mxu0 %v8451_v54 }
 0x2bf   :  { %6704 = vmatpush3.bf16.msra.mxu1 %v7243_v62  ;;  %v7246_v62 = vld [vmem:[%s9088_s2 + $0x100] sm:$0xff]  }
 0x2c0   :  { %6705 = vmatprep.subr.bf16.mxu1 %v7244_v9 }
 0x2c2   :  { %6690 = vmatmul.mubr.bf16.gmra.mrb[12].mxu1 %v8418_v18 }
 0x2c3   :  { %6706 = vmatpush3.bf16.msra.mxu1 %v7244_v9  ;;  %6709 = vmatprep.mubr.bf16.mxu1 %v6061_v21  ;;  %v8485_v9 = vld [vmem:[%s9089_s3 + $0x10] sm:$0xff]   ;;  %v8498_v21 = vld [vmem:[%s9089_s3 + $0x18] sm:$0xff]  }
 0x2c4   :  { %6707 = vmatprep.subr.bf16.mxu1 %v7245_v1 }
 0x2c7   :  { %6708 = vmatpush3.bf16.msra.mxu1 %v7245_v1  ;;  %v8439_v1 = vld [vmem:[#allocation2 + $0x80] sm:$0xff] }
 0x2c8   :  { %6725 = vmatprep.subr.bf16.mxu1 %v7246_v62  ;;  %v6064_v43 = vpack.c.bf16 %v8439_v1, %v8311_v13  ;;  %v7251_v13 = vld [vmem:[%s9088_s2 + $0x128] sm:$0xff]  }
 0x2ca   :  { %6710 = vmatmul.mubr.bf16.vlgmr.msra.gmra.mrb[0].mxu1 %v6062_v15  ;;  %v6065_v15 = vpack.c.bf16 %v8328_v25, %v8313_v19  ;;  %v6067_v19 = vpack.c.bf16 %v8352_v47, %v8334_v22  ;;  %v8468_v25 = vld [vmem:[%s9089_s3 + $0x8] sm:$0xff]   ;;  %v6068_v22 = vpack.c.bf16 %v8474_v12, %v8354_v48  ;;  %v7253_v47 = vld [vmem:[%s9088_s2 + $0x138] sm:$0xff]   ;;  %v7254_v48 = vld [vmem:[%s9088_s2 + $0x140] sm:$0xff]  }
 0x2cb   :  { %6713 = vmatprep.mubr.bf16.mxu1 %v6063_v35  ;;  %6726 = vmatpush3.bf16.msra.mxu1 %v7246_v62  ;;  %v5931_v62 = vld [vmem:[%s9086_s0 + $0x3a0] sm:$0xff]  ;;  %v5932_v35 = vld [vmem:[%s9086_s0 + $0x3b0] sm:$0xff] }
 0x2cc   :  { %6727 = vmatprep.subr.bf16.mxu1 %v7247_v55  ;;  %6887 = vmatprep.subr.bf16.mxu0 %v8468_v25  ;;  %v6111_v44 = vpack.c.bf16 %v5932_v35, %v5931_v62  ;;  %v4182_v62 = vld [vmem:[#allocation2 + $0x61] sm:$0xff]  ;;  %v4183_v35 = vld [vmem:[#allocation2 + $0x71] sm:$0xff] }
 0x2cd   :  { %6888 = vmatpush3.bf16.msra.mxu0 %v8468_v25 }
 0x2ce   :  { %6889 = vmatprep.subr.bf16.mxu0 %v8485_v9 }
 0x2cf   :  { %6728 = vmatpush3.bf16.msra.mxu1 %v7247_v55  ;;  %v7250_v55 = vld [vmem:[%s9088_s2 + $0x120] sm:$0xff]  }
 0x2d0   :  { %6729 = vmatprep.subr.bf16.mxu1 %v7248_v38 }
 0x2d1   :  { %6890 = vmatpush3.bf16.msra.mxu0 %v8485_v9 }
 0x2d2   :  { %6714 = vmatmul.mubr.bf16.gmra.mrb[4].mxu1 %v6064_v43  ;;  %6891 = vmatprep.subr.bf16.mxu0 %v8498_v21  ;;  %v7259_v43 = vld [vmem:[%s9088_s2 + $0x168] sm:$0xff]  }
 0x2d3   :  { %6717 = vmatprep.mubr.bf16.mxu1 %v6065_v15  ;;  %6730 = vmatpush3.bf16.msra.mxu1 %v7248_v38  ;;  %v5933_v38 = vld [vmem:[%s9086_s0 + $0x3c0] sm:$0xff]  ;;  %v9099_v15 = vpack.c.bf16 %v8169_v52, %v8167_v5 }
 0x2d4   :  { %6731 = vmatprep.subr.bf16.mxu1 %v7249_v53  ;;  %v5938_v5 = vld [vmem:[%s9086_s0 + $0x420] sm:$0xff] }
 0x2d5   :  { %6892 = vmatpush3.bf16.msra.mxu0 %v8498_v21 }
 0x2d7   :  { %6732 = vmatpush3.bf16.msra.mxu1 %v7249_v53  ;;  %v9098_v53 = vpack.c.bf16 %v8165_v4, %v8163_v51  ;;  %v7260_v51 = vld [vmem:[%s9088_s2 + $0x170] sm:$0xff]  }
 0x2d8   :  { %6733 = vmatprep.subr.bf16.mxu1 %v7250_v55 }
 0x2da   :  { %6718 = vmatmul.mubr.bf16.gmra.mrb[8].mxu1 %v6066_v3  ;;  %v5936_v3 = vld [vmem:[%s9086_s0 + $0x400] sm:$0xff] }
 0x2db   :  { %6721 = vmatprep.mubr.bf16.mxu1 %v6067_v19  ;;  %6734 = vmatpush3.bf16.msra.mxu1 %v7250_v55  ;;  %v5935_v55 = vld [vmem:[%s9086_s0 + $0x3f0] sm:$0xff]  ;;  %v7261_v19 = vld [vmem:[%s9088_s2 + $0x178] sm:$0xff]  }
 0x2dc   :  { %6735 = vmatprep.subr.bf16.mxu1 %v7251_v13  ;;  %v6113_v4 = vpack.c.bf16 %v5936_v3, %v5935_v55  ;;  %v7282_v55 = vld [vmem:[%s9088_s2 + $0x218] sm:$0xff]  }
 0x2df   :  { %6736 = vmatpush3.bf16.msra.mxu1 %v7251_v13  ;;  %v5937_v13 = vld [vmem:[%s9086_s0 + $0x410] sm:$0xff] }
 0x2e0   :  { %6737 = vmatprep.subr.bf16.mxu1 %v7252_v31  ;;  %v6114_v52 = vpack.c.bf16 %v5938_v5, %v5937_v13  ;;  %v7283_v13 = vld [vmem:[%s9088_s2 + $0x220] sm:$0xff]  }
 0x2e1   :  { %v4190_v5 = vld [vmem:[#allocation2 + $0x101] sm:$0xff] }
 0x2e2   :  { %6722 = vmatmul.mubr.bf16.gmra.mrb[12].mxu1 %v6068_v22  ;;  %v7262_v22 = vld [vmem:[%s9088_s2 + $0x180] sm:$0xff]  }
 0x2e3   :  { %6738 = vmatpush3.bf16.msra.mxu1 %v7252_v31  ;;  %6741 = vmatprep.mubr.bf16.mxu1 %v6069_v11  ;;  %v5928_v11 = vld [vmem:[%s9086_s0 + $0x370] sm:$0xff]  ;;  %v9100_v31 = vpack.c.bf16 %v8226_v23, %v8234_v26  ;;  %v8600_v26 = vld [vmem:[#allocation2 + $0x82] sm:$0xff] }
 0x2e4   :  { %6739 = vmatprep.subr.bf16.mxu1 %v7253_v47  ;;  %v6109_v39 = vpack.c.bf16 %v5928_v11, %v5927_v14  ;;  %v7264_v23 = vld [vmem:[%s9088_s2 + $0x190] sm:$0xff]   ;;  %v8625_v14 = vld [vmem:[#allocation2 + $0x122] sm:$0xff] }
 0x2e5   :  { %v6084_v11 = vpack.c.bf16 %v8625_v14, %v8414_v41 }
 0x2e6   :  { %6893 = vmatprep.mubr.msk.bf16.mxu0 %vm186_vm0, %v6109_v39 }
 0x2e7   :  { %6740 = vmatpush3.bf16.msra.mxu1 %v7253_v47  ;;  %v7263_v47 = vld [vmem:[%s9088_s2 + $0x188] sm:$0xff]  }
 0x2e8   :  { %6757 = vmatprep.subr.bf16.mxu1 %v7254_v48 }
 0x2ea   :  { %6742 = vmatmul.mubr.bf16.vlgmr.msra.gmra.mrb[0].mxu1 %v6070_v29  ;;  %v6110_v29 = vpack.c.bf16 %v5930_v37, %v5929_v33  ;;  %v7273_v33 = vld [vmem:[%s9088_s2 + $0x1d8] sm:$0xff]  }
 0x2eb   :  { %6745 = vmatprep.mubr.bf16.mxu1 %v6071_v34  ;;  %6758 = vmatpush3.bf16.msra.mxu1 %v7254_v48  ;;  %v7257_v34 = vld [vmem:[%s9088_s2 + $0x158] sm:$0xff]   ;;  %v9101_v48 = vpack.c.bf16 %v8230_v24, %v8228_v50  ;;  %v9103_v24 = vpack.c.bf16 %v8245_v0, %v8243_v61  ;;  %v9105_v61 = vpack.c.bf16 %v8260_v17, %v8253_v63  ;;  %v7268_v0 = vld [vmem:[%s9088_s2 + $0x1b0] sm:$0xff]   ;;  %v7271_v63 = vld [vmem:[%s9088_s2 + $0x1c8] sm:$0xff]  }
 0x2ec   :  { %6759 = vmatprep.subr.bf16.mxu1 %v7255_v49  ;;  %6894 = vmatmul.mubr.msk.bf16.vlgmr.msra.gmra.mrb[16].mxu0 %vm186_vm0, %v6110_v29  ;;  %v7265_v50 = vld [vmem:[%s9088_s2 + $0x198] sm:$0xff]   ;;  %v7272_v17 = vld [vmem:[%s9088_s2 + $0x1d0] sm:$0xff]  }
 0x2ed   :  { %6897 = vmatprep.mubr.msk.bf16.mxu0 %vm186_vm0, %v6111_v44  ;;  %v7277_v37 = vld [vmem:[%s9088_s2 + $0x1f8] sm:$0xff]   ;;  %v7280_v44 = vld [vmem:[%s9088_s2 + $0x210] sm:$0xff]  }
 0x2ef   :  { %6760 = vmatpush3.bf16.msra.mxu1 %v7255_v49  ;;  %v6080_v49 = vpack.c.bf16 %v8600_v26, %v8384_v56  ;;  %v9104_v56 = vpack.c.bf16 %v8251_v60, %v8249_v2  ;;  %v7269_v2 = vld [vmem:[%s9088_s2 + $0x1b8] sm:$0xff]   ;;  %v7270_v60 = vld [vmem:[%s9088_s2 + $0x1c0] sm:$0xff]  }
 0x2f0   :  { %6761 = vmatprep.subr.bf16.mxu1 %v7256_v36 }
 0x2f2   :  { %6746 = vmatmul.mubr.bf16.gmra.mrb[4].mxu1 %v8204_v42  ;;  %v7258_v42 = vld [vmem:[%s9088_s2 + $0x160] sm:$0xff]  }
 0x2f3   :  { %6749 = vmatprep.mubr.bf16.mxu1 %v6073_v45  ;;  %6762 = vmatpush3.bf16.msra.mxu1 %v7256_v36  ;;  %v6112_v45 = vpack.c.bf16 %v5934_v46, %v5933_v38  ;;  %v4179_v36 = vld [vmem:[#allocation2 + $0x31] sm:$0xff]  ;;  %v7279_v38 = vld [vmem:[%s9088_s2 + $0x208] sm:$0xff]  }
 0x2f4   :  { %6763 = vmatprep.subr.bf16.mxu1 %v7257_v34  ;;  %v4184_v46 = vld [vmem:[#allocation2 + $0x81] sm:$0xff] }
 0x2f5   :  { %6898 = vmatmul.mubr.msk.bf16.gmra.mrb[20].mxu0 %vm186_vm0, %v6112_v45  ;;  %v4185_v45 = vld [vmem:[#allocation2 + $0x91] sm:$0xff] }
 0x2f6   :  { %6901 = vmatprep.mubr.msk.bf16.mxu0 %vm186_vm0, %v6113_v4  ;;  %v4189_v4 = vld [vmem:[#allocation2 + $0xf1] sm:$0xff] }
 0x2f7   :  { %6764 = vmatpush3.bf16.msra.mxu1 %v7257_v34  ;;  %v4181_v34 = vld [vmem:[#allocation2 + $0x51] sm:$0xff] }
 0x2f8   :  { %6765 = vmatprep.subr.bf16.mxu1 %v7258_v42 }
 0x2fa   :  { %6750 = vmatmul.mubr.bf16.gmra.mrb[8].mxu1 %v9098_v53  ;;  %v4187_v53 = vld [vmem:[#allocation2 + $0xd1] sm:$0xff] }
 0x2fb   :  { %6753 = vmatprep.mubr.bf16.mxu1 %v9099_v15  ;;  %6766 = vmatpush3.bf16.msra.mxu1 %v7258_v42  ;;  %v6095_v42 = vpack.c.bf16 %v4183_v35, %v4182_v62  ;;  %v6096_v15 = vpack.c.bf16 %v4185_v45, %v4184_v46 }
 0x2fc   :  { %6767 = vmatprep.subr.bf16.mxu1 %v7259_v43 }
 0x2fd   :  { %6902 = vmatmul.mubr.msk.bf16.gmra.mrb[24].mxu0 %vm186_vm0, %v6114_v52  ;;  %v4191_v52 = vld [vmem:[#allocation2 + $0x111] sm:$0xff] }
 0x2ff   :  { %6768 = vmatpush3.bf16.msra.mxu1 %v7259_v43  ;;  %v4186_v43 = vld [vmem:[#allocation2 + $0xc1] sm:$0xff] }
 0x300   :  { %6769 = vmatprep.subr.bf16.mxu1 %v7260_v51  ;;  %v6097_v3 = vpack.c.bf16 %v4187_v53, %v4186_v43 }
 0x302   :  { %6754 = vmatmul.mubr.bf16.gmra.mrb[12].mxu1 %v8217_v59  ;;  %v9102_v59 = vpack.c.bf16 %v8236_v30, %v8232_v57  ;;  %v7266_v57 = vld [vmem:[%s9088_s2 + $0x1a0] sm:$0xff]   ;;  %v7267_v30 = vld [vmem:[%s9088_s2 + $0x1a8] sm:$0xff]  }
 0x303   :  { %6770 = vmatpush3.bf16.msra.mxu1 %v7260_v51  ;;  %6773 = vmatprep.mubr.bf16.mxu1 %v9100_v31  ;;  %v4188_v51 = vld [vmem:[#allocation2 + $0xe1] sm:$0xff] }
 0x304   :  { %6771 = vmatprep.subr.bf16.mxu1 %v7261_v19  ;;  %v7285_v31 = vld [vmem:[%s9088_s2 + $0x228] sm:$0xff]  }
 0x307   :  { %6772 = vmatpush3.bf16.msra.mxu1 %v7261_v19  ;;  %v6098_v19 = vpack.c.bf16 %v4189_v4, %v4188_v51 }
 0x308   :  { %6789 = vmatprep.subr.bf16.mxu1 %v7262_v22 }
 0x30a   :  { %6774 = vmatmul.mubr.bf16.vlgmr.msra.gmra.mrb[0].mxu1 %v9101_v48  ;;  %v4192_v48 = vld [vmem:[#allocation2 + $0x121] sm:$0xff] }
 0x30b   :  { %6777 = vmatprep.mubr.bf16.mxu1 %v9102_v59  ;;  %6790 = vmatpush3.bf16.msra.mxu1 %v7262_v22  ;;  %v6099_v22 = vpack.c.bf16 %v4191_v52, %v4190_v5  ;;  %v4193_v59 = vld [vmem:[#allocation2 + $0x131] sm:$0xff] }
 0x30c   :  { %6791 = vmatprep.subr.bf16.mxu1 %v7263_v47 }
 0x30f   :  { %6792 = vmatpush3.bf16.msra.mxu1 %v7263_v47  ;;  %v7286_v47 = vld [vmem:[%s9088_s2 + $0x230] sm:$0xff]  }
 0x310   :  { %6793 = vmatprep.subr.bf16.mxu1 %v7264_v23 }
 0x312   :  { %6778 = vmatmul.mubr.bf16.gmra.mrb[4].mxu1 %v6080_v49  ;;  %v7288_v49 = vld [vmem:[%s9088_s2 + $0x238] sm:$0xff]  }
 0x313   :  { %6781 = vmatprep.mubr.bf16.mxu1 %v9103_v24  ;;  %6794 = vmatpush3.bf16.msra.mxu1 %v7264_v23  ;;  %v6100_v23 = vpack.c.bf16 %v4193_v59, %v4192_v48 }
 0x314   :  { %6795 = vmatprep.subr.bf16.mxu1 %v7265_v50 }
 0x317   :  { %6796 = vmatpush3.bf16.msra.mxu1 %v7265_v50  ;;  %v4443_v50 = vld [vmem:[#allocation2 + $0x92] sm:$0xff] }
 0x318   :  { %6797 = vmatprep.subr.bf16.mxu1 %v7266_v57  ;;  %v6104_v24 = vpack.c.bf16 %v4443_v50, %v8600_v26 }
 0x31a   :  { %6782 = vmatmul.mubr.bf16.gmra.mrb[8].mxu1 %v9104_v56 }
 0x31b   :  { %6785 = vmatprep.mubr.bf16.mxu1 %v9105_v61  ;;  %6798 = vmatpush3.bf16.msra.mxu1 %v7266_v57 }
 0x31c   :  { %6799 = vmatprep.subr.bf16.mxu1 %v7267_v30 }
 0x31f   :  { %6800 = vmatpush3.bf16.msra.mxu1 %v7267_v30 }
 0x320   :  { %6801 = vmatprep.subr.bf16.mxu1 %v7268_v0 }
 0x322   :  { %6786 = vmatmul.mubr.bf16.gmra.mrb[12].mxu1 %v6084_v11 }
 0x323   :  { %6802 = vmatpush3.bf16.msra.mxu1 %v7268_v0  ;;  %6805 = vmatprep.mubr.bf16.mxu1 %v8295_v58  ;;  %v7297_v58 = vld [vmem:[#allocation2] sm:$0xff] }
 0x324   :  { %6803 = vmatprep.subr.bf16.mxu1 %v7269_v2  ;;  %v6088_v41 = vpack.c.bf16 %v7297_v58, %v8439_v1  ;;  %v4178_v1 = vld [vmem:[#allocation2 + $0x21] sm:$0xff]  ;;  %v6092_v39 = vpack.c.bf16 %v7297_v58, %v8474_v12 }
 0x325   :  { %v6093_v29 = vpack.c.bf16 %v4179_v36, %v4178_v1 }
 0x327   :  { %6804 = vmatpush3.bf16.msra.mxu1 %v7269_v2 }
 0x328   :  { %6821 = vmatprep.subr.bf16.mxu1 %v7270_v60 }
 0x32a   :  { %6806 = vmatmul.mubr.bf16.vlgmr.msra.gmra.mrb[0].mxu1 %v8302_v8  ;;  %v7274_v8 = vld [vmem:[%s9088_s2 + $0x1e0] sm:$0xff]  }
 0x32b   :  { %6809 = vmatprep.mubr.bf16.mxu1 %v8317_v28  ;;  %6822 = vmatpush3.bf16.msra.mxu1 %v7270_v60  ;;  %v7275_v28 = vld [vmem:[%s9088_s2 + $0x1e8] sm:$0xff]  }
 0x32c   :  { %6823 = vmatprep.subr.bf16.mxu1 %v7271_v63 }
 0x32f   :  { %6824 = vmatpush3.bf16.msra.mxu1 %v7271_v63 }
 0x330   :  { %6825 = vmatprep.subr.bf16.mxu1 %v7272_v17 }
 0x332   :  { %6810 = vmatmul.mubr.bf16.gmra.mrb[4].mxu1 %v6088_v41 }
 0x333   :  { %6813 = vmatprep.mubr.bf16.mxu1 %v8338_v32  ;;  %6826 = vmatpush3.bf16.msra.mxu1 %v7272_v17  ;;  %v7276_v32 = vld [vmem:[%s9088_s2 + $0x1f0] sm:$0xff]  }
 0x334   :  { %6827 = vmatprep.subr.bf16.mxu1 %v7273_v33 }
 0x337   :  { %6828 = vmatpush3.bf16.msra.mxu1 %v7273_v33 }
 0x338   :  { %6829 = vmatprep.subr.bf16.mxu1 %v7274_v8 }
 0x33a   :  { %6814 = vmatmul.mubr.bf16.gmra.mrb[8].mxu1 %v8345_v40  ;;  %v7278_v40 = vld [vmem:[%s9088_s2 + $0x200] sm:$0xff]  }
 0x33b   :  { %6817 = vmatprep.mubr.bf16.mxu1 %v8358_v10  ;;  %6830 = vmatpush3.bf16.msra.mxu1 %v7274_v8  ;;  %v4180_v10 = vld [vmem:[#allocation2 + $0x41] sm:$0xff] }
 0x33c   :  { %6831 = vmatprep.subr.bf16.mxu1 %v7275_v28  ;;  %v6094_v12 = vpack.c.bf16 %v4181_v34, %v4180_v10 }
 0x33f   :  { %6832 = vmatpush3.bf16.msra.mxu1 %v7275_v28 }
 0x340   :  { %6833 = vmatprep.subr.bf16.mxu1 %v7276_v32 }
 0x342   :  { %6818 = vmatmul.mubr.bf16.gmra.mrb[12].mxu1 %v6092_v39 }
 0x343   :  { %6834 = vmatpush3.bf16.msra.mxu1 %v7276_v32  ;;  %6837 = vmatprep.mubr.bf16.mxu1 %v6093_v29 }
 0x344   :  { %6835 = vmatprep.subr.bf16.mxu1 %v7277_v37 }
 0x347   :  { %6836 = vmatpush3.bf16.msra.mxu1 %v7277_v37 }
 0x348   :  { %6853 = vmatprep.subr.bf16.mxu1 %v7278_v40 }
 0x34a   :  { %6838 = vmatmul.mubr.bf16.vlgmr.msra.gmra.mrb[0].mxu1 %v6094_v12 }
 0x34b   :  { %6841 = vmatprep.mubr.bf16.mxu1 %v6095_v42  ;;  %6854 = vmatpush3.bf16.msra.mxu1 %v7278_v40 }
 0x34c   :  { %6855 = vmatprep.subr.bf16.mxu1 %v7279_v38 }
 0x34f   :  { %6856 = vmatpush3.bf16.msra.mxu1 %v7279_v38 }
 0x350   :  { %6857 = vmatprep.subr.bf16.mxu1 %v7280_v44 }
 0x352   :  { %6842 = vmatmul.mubr.bf16.gmra.mrb[4].mxu1 %v6096_v15 }
 0x353   :  { %6845 = vmatprep.mubr.bf16.mxu1 %v6097_v3  ;;  %6858 = vmatpush3.bf16.msra.mxu1 %v7280_v44 }
 0x354   :  { %6859 = vmatprep.subr.bf16.mxu1 %v7282_v55 }
 0x357   :  { %6860 = vmatpush3.bf16.msra.mxu1 %v7282_v55 }
 0x358   :  { %6861 = vmatprep.subr.bf16.mxu1 %v7283_v13 }
 0x35a   :  { %6846 = vmatmul.mubr.bf16.gmra.mrb[8].mxu1 %v6098_v19 }
 0x35b   :  { %6849 = vmatprep.mubr.bf16.mxu1 %v6099_v22  ;;  %6862 = vmatpush3.bf16.msra.mxu1 %v7283_v13 }
 0x35c   :  { %6863 = vmatprep.subr.bf16.mxu1 %v7285_v31 }
 0x35f   :  { %6864 = vmatpush3.bf16.msra.mxu1 %v7285_v31 }
 0x360   :  { %6865 = vmatprep.subr.bf16.mxu1 %v7286_v47 }
 0x362   :  { %6850 = vmatmul.mubr.bf16.gmra.mrb[12].mxu1 %v6100_v23 }
 0x363   :  { %6866 = vmatpush3.bf16.msra.mxu1 %v7286_v47  ;;  %6869 = vmatprep.mubr.bf16.mxu1 %v8370_v27  ;;  %v5940_v27 = vld [vmem:[%s9086_s0 + $0x440] sm:$0xff] }
 0x364   :  { %6867 = vmatprep.subr.bf16.mxu1 %v7288_v49 }
 0x367   :  { %6868 = vmatpush3.bf16.msra.mxu1 %v7288_v49 }
 0x368   :  { %6909 = vmatprep.subr.bf16.mxu1 %v8451_v54 }
 0x36a   :  { %6870 = vmatmul.mubr.bf16.vlgmr.msra.gmra.mrb[0].mxu1 %v8377_v7  ;;  %v4451_v7 = vld [vmem:[#allocation2 + $0x132] sm:$0xff] }
 0x36b   :  { %6873 = vmatprep.mubr.bf16.mxu1 %v8388_v20  ;;  %6913 = vmatpush3.bf16.msra.mxu1 %v8451_v54  ;;  %v5939_v20 = vld [vmem:[%s9086_s0 + $0x430] sm:$0xff]  ;;  %v6108_v54 = vpack.c.bf16 %v4451_v7, %v8625_v14 }
 0x36c   :  { %6910 = vmatprep.subr.bf16.mxu1 %v8468_v25 }
 0x36f   :  { %6914 = vmatpush3.bf16.msra.mxu1 %v8468_v25 }
 0x370   :  { %6911 = vmatprep.subr.bf16.mxu1 %v8485_v9 }
 0x372   :  { %6874 = vmatmul.mubr.bf16.gmra.mrb[4].mxu1 %v6104_v24 }
 0x373   :  { %6877 = vmatprep.mubr.bf16.mxu1 %v8400_v6  ;;  %6915 = vmatpush3.bf16.msra.mxu1 %v8485_v9  ;;  %v6115_v6 = vpack.c.bf16 %v5940_v27, %v5939_v20 }
 0x374   :  { %6912 = vmatprep.subr.bf16.mxu1 %v8498_v21 }
 0x377   :  { %6916 = vmatpush3.bf16.msra.mxu1 %v8498_v21 }
 0x37a   :  { %6878 = vmatmul.mubr.bf16.gmra.mrb[8].mxu1 %v8407_v16  ;;  %v5941_v16 = vld [vmem:[%s9086_s0 + $0x450] sm:$0xff] }
 0x37b   :  { %6881 = vmatprep.mubr.bf16.mxu1 %v8418_v18  ;;  %v5942_v18 = vld [vmem:[%s9086_s0 + $0x460] sm:$0xff] }
 0x37c   :  { %v6116_v25 = vpack.c.bf16 %v5942_v18, %v5941_v16 }
 0x382   :  { %6882 = vmatmul.mubr.bf16.gmra.mrb[12].mxu1 %v6108_v54 }
 0x383   :  { %6905 = vmatprep.mubr.msk.bf16.mxu1 %vm186_vm0, %v6115_v6 }
 0x38a   :  { %6906 = vmatmul.mubr.msk.bf16.vlgmr.msra.gmra.mrb[16].mxu1 %vm186_vm0, %v6116_v25 }
 0x3bf   :  { %v8718_v9 = vpop.f32.mrb[16].mxu0 }
 0x3c0   :  { %v8720_v21 = vpop.f32.mrb[17].mxu0 }
 0x3c1   :  { %v8722_v26 = vpop.f32.mrb[18].mxu0 }
 0x3c2   :  { %v8724_v57 = vpop.f32.mrb[19].mxu0 }
 0x3c3   :  { %v5059_v30 = vadd.f32 %v8724_v57, %v8720_v21 }
 0x3c5   :  { %v5060_v56 = vadd.f32 %v8718_v9, %v5059_v30 }
 0x3c7   :  { %v5061_v14 = vadd.f32 %v8722_v26, %v5060_v56 }
 0x3c8   :  { %v8729_v61 = vpop.f32.mrb[20].mxu0 }
 0x3c9   :  { %v8731_v0 = vpop.f32.mrb[21].mxu0 }
 0x3ca   :  { %v8734_v11 = vpop.f32.mrb[22].mxu0  ;;  %v5062_v2 = vadd.f32 %v5061_v14, %v8731_v0 }
 0x3cb   :  { %v8737_v60 = vpop.f32.mrb[23].mxu0 }
 0x3cc   :  { %v5063_v63 = vadd.f32 %v5062_v2, %v8737_v60 }
 0x3ce   :  { %v5064_v17 = vadd.f32 %v8729_v61, %v5063_v63 }
 0x3d0   :  { %v8741_v58 = vpop.f32.mrb[24].mxu0  ;;  %v5065_v33 = vadd.f32 %v8734_v11, %v5064_v17 }
 0x3d1   :  { %v8743_v41 = vpop.f32.mrb[25].mxu0 }
 0x3d2   :  { %v8746_v8 = vpop.f32.mrb[26].mxu0  ;;  %v5066_v28 = vadd.f32 %v5065_v33, %v8743_v41 }
 0x3d3   :  { %v8749_v32 = vpop.f32.mrb[27].mxu0 }
 0x3d4   :  { %v5067_v1 = vadd.f32 %v5066_v28, %v8749_v32 }
 0x3d6   :  { %v5068_v36 = vadd.f32 %v8741_v58, %v5067_v1 }
 0x3d8   :  { %v5069_v39 = vadd.f32 %v8746_v8, %v5068_v36 }
 0x43d   :  { %v6871_v37 = vpop.f32.mrb[0].mxu1 }
 0x43e   :  { %v4615_v29 = vpop.f32.mrb[1].mxu1 }
 0x43f   :  { %v6872_v40 = vpop.f32.mrb[2].mxu1 }
 0x440   :  { %v4618_v10 = vpop.f32.mrb[3].mxu1 }
 0x441   :  { %v4694_v34 = vadd.f32 %v4618_v10, %v4615_v29 }
 0x443   :  { %v4695_v62 = vadd.f32 %v6871_v37, %v4694_v34 }
 0x445   :  { %v6875_v35 = vpop.f32.mrb[4].mxu1  ;;  %v4696_v12 = vadd.f32 %v6872_v40, %v4695_v62 }
 0x446   :  { %v4631_v38 = vpop.f32.mrb[5].mxu1 }
 0x447   :  { %v4697_v42 = vadd.f32 %v4696_v12, %v4631_v38  ;;  %v6876_v44 = vpop.f32.mrb[6].mxu1 }
 0x448   :  { %v4634_v46 = vpop.f32.mrb[7].mxu1 }
 0x449   :  { %v4698_v45 = vadd.f32 %v4697_v42, %v4634_v46 }
 0x44b   :  { %v4699_v43 = vadd.f32 %v6875_v35, %v4698_v45 }
 0x44d   :  { %v6879_v53 = vpop.f32.mrb[8].mxu1  ;;  %v4700_v15 = vadd.f32 %v6876_v44, %v4699_v43 }
 0x44e   :  { %v4647_v55 = vpop.f32.mrb[9].mxu1 }
 0x44f   :  { %v4701_v3 = vadd.f32 %v4700_v15, %v4647_v55  ;;  %v6880_v13 = vpop.f32.mrb[10].mxu1 }
 0x450   :  { %v4650_v51 = vpop.f32.mrb[11].mxu1 }
 0x451   :  { %v4702_v4 = vadd.f32 %v4701_v3, %v4650_v51 }
 0x453   :  { %v4703_v5 = vadd.f32 %v6879_v53, %v4702_v4 }
 0x455   :  { %v6883_v52 = vpop.f32.mrb[12].mxu1  ;;  %v4704_v19 = vadd.f32 %v6880_v13, %v4703_v5 }
 0x456   :  { %v4663_v31 = vpop.f32.mrb[13].mxu1 }
 0x457   :  { %v4705_v22 = vadd.f32 %v4704_v19, %v4663_v31  ;;  %v6884_v47 = vpop.f32.mrb[14].mxu1 }
 0x458   :  { %v4666_v48 = vpop.f32.mrb[15].mxu1 }
 0x459   :  { %v4706_v59 = vadd.f32 %v4705_v22, %v4666_v48 }
 0x45b   :  { %v4707_v23 = vadd.f32 %v6883_v52, %v4706_v59 }
 0x45d   :  { %v4708_v49 = vadd.f32 %v6884_v47, %v4707_v23  ;;  %v8754_v50 = vpop.f32.mrb[16].mxu1 }
 0x45e   :  { %v8756_v24 = vpop.f32.mrb[17].mxu1 }
 0x45f   :  { %v4709_v20 = vrot.slane %v4708_v49, 4  ;;  %v5070_v27 = vadd.f32 %v5069_v39, %v8756_v24  ;;  %v8759_v7 = vpop.f32.mrb[18].mxu1 }
 0x460   :  { %v5047_v6 = vpop.f32.mrb[19].mxu1 }
 0x461   :  { %v4710_v54 = vadd.f32 %v4709_v20, %v4708_v49  ;;  %v5071_v16 = vadd.f32 %v5070_v27, %v5047_v6 }
 0x463   :  { %v4711_v18 = vrot.slane %v4710_v54, 2  ;;  %v5072_v25 = vadd.f32 %v8754_v50, %v5071_v16 }
 0x465   :  { %v4712_v30 = vadd.f32 %v4711_v18, %v4710_v54  ;;  %v5073_v56 = vadd.f32 %v8759_v7, %v5072_v25 }
 0x467   :  { %v4713_v14 = vrot.slane %v4712_v30, 1  ;;  %v5074_v2 = vrot.slane %v5073_v56, 4 }
 0x469   :  { %v4714_v63 = vadd.f32 %v4713_v14, %v4712_v30  ;;  %v5075_v33 = vadd.f32 %v5074_v2, %v5073_v56 }
 0x46b   :  { %v4715_v17 = vmul.f32 0.0078125, %v4714_v63  ;;  %v5076_v15 = vrot.slane %v5075_v33, 2 }
 0x46d   :  { %v8763_v28 = vsub.f32 %v4615_v29, %v4715_v17  ;;  %v8765_v1 = vsub.f32 %v4618_v10, %v4715_v17  ;;  %v8767_v36 = vsub.f32 %v6871_v37, %v4715_v17  ;;  %v8769_v39 = vsub.f32 %v6872_v40, %v4715_v17 }
 0x46e   :  { %v8771_v34 = vsub.f32 %v4631_v38, %v4715_v17  ;;  %v8773_v62 = vsub.f32 %v4634_v46, %v4715_v17  ;;  %v8775_v12 = vsub.f32 %v6875_v35, %v4715_v17  ;;  %v8777_v42 = vsub.f32 %v6876_v44, %v4715_v17 }
 0x46f   :  { %v8779_v45 = vsub.f32 %v4647_v55, %v4715_v17  ;;  %v8781_v43 = vsub.f32 %v4650_v51, %v4715_v17  ;;  %v8783_v29 = vsub.f32 %v6879_v53, %v4715_v17  ;;  %v8785_v10 = vsub.f32 %v6880_v13, %v4715_v17 }
 0x470   :  { %v8787_v37 = vsub.f32 %v4663_v31, %v4715_v17  ;;  %v8789_v40 = vsub.f32 %v4666_v48, %v4715_v17  ;;  %v8791_v38 = vsub.f32 %v6883_v52, %v4715_v17  ;;  %v8793_v46 = vsub.f32 %v6884_v47, %v4715_v17 }
 0x471   :  { %v4732_v35 = vmul.f32 %v8763_v28, %v8763_v28  ;;  %v4733_v44 = vmul.f32 %v8765_v1, %v8765_v1  ;;  %v4734_v53 = vmul.f32 %v8767_v36, %v8767_v36  ;;  %v5077_v3 = vadd.f32 %v5076_v15, %v5075_v33 }
 0x472   :  { %v4735_v13 = vmul.f32 %v8769_v39, %v8769_v39  ;;  %v4736_v5 = vmul.f32 %v8771_v34, %v8771_v34  ;;  %v4737_v31 = vmul.f32 %v8773_v62, %v8773_v62  ;;  %v4738_v48 = vmul.f32 %v8775_v12, %v8775_v12 }
 0x473   :  { %v4748_v55 = vadd.f32 %v4733_v44, %v4732_v35  ;;  %v5078_v4 = vrot.slane %v5077_v3, 1  ;;  %v4739_v59 = vmul.f32 %v8777_v42, %v8777_v42  ;;  %v4742_v14 = vmul.f32 %v8783_v29, %v8783_v29 }
 0x474   :  { %v4744_v44 = vmul.f32 %v8787_v37, %v8787_v37 }
 0x475   :  { %v4749_v51 = vadd.f32 %v4748_v55, %v4734_v53  ;;  %v5079_v19 = vadd.f32 %v5078_v4, %v5077_v3  ;;  %v4745_v3 = vmul.f32 %v8789_v40, %v8789_v40 }
 0x477   :  { %v4750_v52 = vadd.f32 %v4749_v51, %v4735_v13  ;;  %v5080_v47 = vmul.f32 0.0078125, %v5079_v19 }
 0x479   :  { %v4751_v22 = vadd.f32 %v4750_v52, %v4736_v5  ;;  %v8812_v49 = vsub.f32 %v8720_v21, %v5080_v47  ;;  %v8815_v20 = vsub.f32 %v8724_v57, %v5080_v47  ;;  %v8818_v27 = vsub.f32 %v8718_v9, %v5080_v47 }
 0x47a   :  { %v8821_v54 = vsub.f32 %v8722_v26, %v5080_v47  ;;  %v8824_v16 = vsub.f32 %v8731_v0, %v5080_v47  ;;  %v8827_v18 = vsub.f32 %v8737_v60, %v5080_v47  ;;  %v8830_v25 = vsub.f32 %v8729_v61, %v5080_v47 }
 0x47b   :  { %v4752_v23 = vadd.f32 %v4751_v22, %v4737_v31  ;;  %v8833_v30 = vsub.f32 %v8734_v11, %v5080_v47  ;;  %v8836_v57 = vsub.f32 %v8743_v41, %v5080_v47  ;;  %v8839_v9 = vsub.f32 %v8749_v32, %v5080_v47 }
 0x47c   :  { %v8842_v26 = vsub.f32 %v8741_v58, %v5080_v47  ;;  %v8845_v0 = vsub.f32 %v8746_v8, %v5080_v47  ;;  %v8848_v60 = vsub.f32 %v8756_v24, %v5080_v47  ;;  %v8850_v61 = vsub.f32 %v5047_v6, %v5080_v47 }
 0x47d   :  { %v4753_v21 = vadd.f32 %v4752_v23, %v4738_v48  ;;  %v4740_v11 = vmul.f32 %v8779_v45, %v8779_v45  ;;  %v8855_v41 = vsub.f32 %v8754_v50, %v5080_v47  ;;  %v8858_v32 = vsub.f32 %v8759_v7, %v5080_v47 }
 0x47e   :  { %v5097_v58 = vmul.f32 %v8812_v49, %v8812_v49  ;;  %v5098_v8 = vmul.f32 %v8815_v20, %v8815_v20  ;;  %v4741_v24 = vmul.f32 %v8781_v43, %v8781_v43  ;;  %v5099_v50 = vmul.f32 %v8818_v27, %v8818_v27 }
 0x47f   :  { %v4754_v56 = vadd.f32 %v4753_v21, %v4739_v59  ;;  %v4743_v7 = vmul.f32 %v8785_v10, %v8785_v10  ;;  %v5100_v33 = vmul.f32 %v8821_v54, %v8821_v54  ;;  %v5101_v53 = vmul.f32 %v8824_v16, %v8824_v16 }
 0x480   :  { %v5113_v63 = vadd.f32 %v5098_v8, %v5097_v58  ;;  %v5102_v51 = vmul.f32 %v8827_v18, %v8827_v18  ;;  %v4746_v5 = vmul.f32 %v8791_v38, %v8791_v38  ;;  %v5103_v19 = vmul.f32 %v8830_v25, %v8830_v25 }
 0x481   :  { %v4755_v6 = vadd.f32 %v4754_v56, %v4740_v11  ;;  %v4747_v22 = vmul.f32 %v8793_v46, %v8793_v46  ;;  %v5104_v48 = vmul.f32 %v8833_v30, %v8833_v30  ;;  %v5105_v21 = vmul.f32 %v8836_v57, %v8836_v57 }
 0x482   :  { %v5114_v35 = vadd.f32 %v5113_v63, %v5099_v50  ;;  %v5106_v58 = vmul.f32 %v8839_v9, %v8839_v9  ;;  %v5108_v50 = vmul.f32 %v8845_v0, %v8845_v0 }
 0x483   :  { %v4756_v2 = vadd.f32 %v4755_v6, %v4741_v24  ;;  %v5107_v6 = vmul.f32 %v8842_v26, %v8842_v26 }
 0x484   :  { %v5115_v55 = vadd.f32 %v5114_v35, %v5100_v33 }
 0x485   :  { %v4757_v17 = vadd.f32 %v4756_v2, %v4742_v14 }
 0x486   :  { %v5116_v4 = vadd.f32 %v5115_v55, %v5101_v53  ;;  %v5111_v55 = vmul.f32 %v8855_v41, %v8855_v41 }
 0x487   :  { %v4758_v15 = vadd.f32 %v4757_v17, %v4743_v7  ;;  %v5109_v17 = vmul.f32 %v8848_v60, %v8848_v60 }
 0x488   :  { %v5117_v31 = vadd.f32 %v5116_v4, %v5102_v51  ;;  %v5112_v51 = vmul.f32 %v8858_v32, %v8858_v32 }
 0x489   :  { %v4759_v13 = vadd.f32 %v4758_v15, %v4744_v44  ;;  %v5110_v44 = vmul.f32 %v8850_v61, %v8850_v61 }
 0x48a   :  { %v5118_v59 = vadd.f32 %v5117_v31, %v5103_v19 }
 0x48b   :  { %v4760_v52 = vadd.f32 %v4759_v13, %v4745_v3 }
 0x48c   :  { %v5119_v11 = vadd.f32 %v5118_v59, %v5104_v48 }
 0x48d   :  { %v4761_v47 = vadd.f32 %v4760_v52, %v4746_v5 }
 0x48e   :  { %v5120_v8 = vadd.f32 %v5119_v11, %v5105_v21 }
 0x48f   :  { %v4762_v23 = vadd.f32 %v4761_v47, %v4747_v22 }
 0x490   :  { %v5121_v14 = vadd.f32 %v5120_v8, %v5106_v58 }
 0x491   :  { %v4763_v56 = vrot.slane %v4762_v23, 4 }
 0x492   :  { %v5122_v63 = vadd.f32 %v5121_v14, %v5107_v6 }
 0x493   :  { %v4764_v24 = vadd.f32 %v4763_v56, %v4762_v23 }
 0x494   :  { %v5123_v33 = vadd.f32 %v5122_v63, %v5108_v50 }
 0x495   :  { %v4765_v2 = vrot.slane %v4764_v24, 2 }
 0x496   :  { %v5124_v15 = vadd.f32 %v5123_v33, %v5109_v17 }
 0x497   :  { %v4766_v7 = vadd.f32 %v4765_v2, %v4764_v24 }
 0x498   :  { %v5125_v3 = vadd.f32 %v5124_v15, %v5110_v44 }
 0x499   :  { %v4767_v35 = vrot.slane %v4766_v7, 1 }
 0x49a   :  { %v5126_v4 = vadd.f32 %v5125_v3, %v5111_v55 }
 0x49b   :  { %v4768_v53 = vadd.f32 %v4767_v35, %v4766_v7 }
 0x49c   :  { %v5127_v52 = vadd.f32 %v5126_v4, %v5112_v51 }
 0x49d   :  { %v4769_v13 = vmul.f32 0.0078125, %v4768_v53 }
 0x49e   :  { %v5128_v19 = vrot.slane %v5127_v52, 4 }
 0x49f   :  { %v4770_v5 = vadd.f32 1e-05, %v4769_v13 }
 0x4a0   :  { %v5129_v31 = vadd.f32 %v5128_v19, %v5127_v52 }
 0x4a1   :  { %7292 = vrsqrt.f32 %v4770_v5 }
 0x4a2   :  { %v5130_v47 = vrot.slane %v5129_v31, 2 }
 0x4a4   :  { %v5131_v14 = vadd.f32 %v5130_v47, %v5129_v31 }
 0x4ab   :  { %v7293_v22 = vpop.eup %7292 }
 0x4ac   :  { %v4772_v48 = vmul.f32 %v7293_v22, %v8763_v28  ;;  %v4773_v59 = vmul.f32 %v7293_v22, %v8765_v1  ;;  %v4774_v23 = vmul.f32 %v7293_v22, %v8767_v36  ;;  %v4775_v21 = vmul.f32 %v7293_v22, %v8769_v39 }
 0x4ad   :  { %v4776_v11 = vmul.f32 %v7293_v22, %v8771_v34  ;;  %v4777_v56 = vmul.f32 %v7293_v22, %v8773_v62  ;;  %v4778_v58 = vmul.f32 %v7293_v22, %v8775_v12  ;;  %v4779_v8 = vmul.f32 %v7293_v22, %v8777_v42 }
 0x4ae   :  { %v4780_v24 = vmul.f32 %v7293_v22, %v8779_v45  ;;  %v4781_v6 = vmul.f32 %v7293_v22, %v8781_v43  ;;  %v4782_v28 = vmul.f32 %v7293_v22, %v8783_v29  ;;  %v4783_v1 = vmul.f32 %v7293_v22, %v8785_v10  ;;  %v5925_v45 = vld [vmem:[%s9092_s6] ss:$0 sm:$0xff] }
 0x4af   :  { %v4784_v36 = vmul.f32 %v7293_v22, %v8787_v37  ;;  %v4785_v39 = vmul.f32 %v7293_v22, %v8789_v40  ;;  %v4786_v34 = vmul.f32 %v7293_v22, %v8791_v38  ;;  %v4787_v62 = vmul.f32 %v7293_v22, %v8793_v46  ;;  %v5926_v46 = vld [vmem:[%s9093_s7] ss:$0 sm:$0xff] }
 0x4b0   :  { %v5132_v12 = vrot.slane %v5131_v14, 1  ;;  %v4795_v43 = vmul.f32 %v5925_v45, %v4772_v48  ;;  %v4796_v29 = vmul.f32 %v5925_v45, %v4773_v59  ;;  %v4797_v10 = vmul.f32 %v5925_v45, %v4774_v23 }
 0x4b1   :  { %v4798_v37 = vmul.f32 %v5925_v45, %v4775_v21  ;;  %v4799_v63 = vmul.f32 %v5925_v45, %v4776_v11  ;;  %v4800_v40 = vmul.f32 %v5925_v45, %v4777_v56  ;;  %v4801_v7 = vmul.f32 %v5925_v45, %v4778_v58 }
 0x4b2   :  { %v5133_v2 = vadd.f32 %v5132_v12, %v5131_v14  ;;  %v4802_v38 = vmul.f32 %v5925_v45, %v4779_v8  ;;  %v4803_v17 = vmul.f32 %v5925_v45, %v4780_v24  ;;  %v4804_v33 = vmul.f32 %v5925_v45, %v4781_v6  ;;  %v5963_v14 = vld [vmem:[%s9094_s8] ss:$0 sm:$0xff] }
 0x4b3   :  { %v4805_v35 = vmul.f32 %v5925_v45, %v4782_v28  ;;  %v4806_v44 = vmul.f32 %v5925_v45, %v4783_v1  ;;  %v4807_v15 = vmul.f32 %v5925_v45, %v4784_v36  ;;  %v4808_v53 = vmul.f32 %v5925_v45, %v4785_v39 }
 0x4b4   :  { %v5134_v42 = vmul.f32 0.0078125, %v5133_v2  ;;  %v4809_v55 = vmul.f32 %v5925_v45, %v4786_v34  ;;  %v4810_v3 = vmul.f32 %v5925_v45, %v4787_v62  ;;  %v8928_v13 = vadd.f32 %v5926_v46, %v4795_v43 }
 0x4b5   :  { %v8930_v51 = vadd.f32 %v5926_v46, %v4796_v29  ;;  %v8932_v4 = vadd.f32 %v5926_v46, %v4797_v10  ;;  %v8934_v5 = vadd.f32 %v5926_v46, %v4798_v37  ;;  %v8936_v52 = vadd.f32 %v5926_v46, %v4799_v63 }
 0x4b6   :  { %v5135_v50 = vadd.f32 1e-05, %v5134_v42  ;;  %v8938_v19 = vadd.f32 %v5926_v46, %v4800_v40  ;;  %v8940_v31 = vadd.f32 %v5926_v46, %v4801_v7  ;;  %v8942_v22 = vadd.f32 %v5926_v46, %v4802_v38 }
 0x4b7   :  { %v8944_v47 = vadd.f32 %v5926_v46, %v4803_v17  ;;  %v8946_v48 = vadd.f32 %v5926_v46, %v4804_v33  ;;  %v8948_v59 = vadd.f32 %v5926_v46, %v4805_v35  ;;  %v8950_v23 = vadd.f32 %v5926_v46, %v4806_v44 }
 0x4b8   :  { %7294 = vrsqrt.f32 %v5135_v50  ;;  %v8952_v11 = vadd.f32 %v5926_v46, %v4807_v15  ;;  %v8954_v56 = vadd.f32 %v5926_v46, %v4808_v53  ;;  %v8956_v58 = vadd.f32 %v5926_v46, %v4809_v55 }
 0x4b9   :  { %v8958_v8 = vadd.f32 %v5926_v46, %v4810_v3 }
 0x4c2   :  { %v7295_v21 = vpop.eup %7294 }
 0x4c3   :  { %v5137_v24 = vmul.f32 %v7295_v21, %v8812_v49  ;;  %v5138_v6 = vmul.f32 %v7295_v21, %v8815_v20  ;;  %v5139_v28 = vmul.f32 %v7295_v21, %v8818_v27  ;;  %v5140_v1 = vmul.f32 %v7295_v21, %v8821_v54 }
 0x4c4   :  { %v5141_v36 = vmul.f32 %v7295_v21, %v8824_v16  ;;  %v5142_v39 = vmul.f32 %v7295_v21, %v8827_v18  ;;  %v5143_v34 = vmul.f32 %v7295_v21, %v8830_v25  ;;  %v5144_v62 = vmul.f32 %v7295_v21, %v8833_v30 }
 0x4c5   :  { %v5145_v49 = vmul.f32 %v7295_v21, %v8836_v57  ;;  %v5146_v20 = vmul.f32 %v7295_v21, %v8839_v9  ;;  %v5147_v27 = vmul.f32 %v7295_v21, %v8842_v26  ;;  %v5148_v54 = vmul.f32 %v7295_v21, %v8845_v0  ;;  %v5964_v26 = vld [vmem:[%s9095_s9] ss:$0 sm:$0xff]  ;;  %s7347_s9 = smov [#allocation5]  }
 0x4c6   :  { %v5149_v16 = vmul.f32 %v7295_v21, %v8848_v60  ;;  %v5150_v18 = vmul.f32 %v7295_v21, %v8850_v61  ;;  %v5151_v25 = vmul.f32 %v7295_v21, %v8855_v41  ;;  %v5152_v30 = vmul.f32 %v7295_v21, %v8858_v32  ;;  %s5280_s19 = sshll.u32 %s7347_s9, 4  ;;  %s9026_s19 = int_to_ptr.vmem [resolvable:$true] %s5280_s19 }
 0x4c7   :  { %v5160_v12 = vmul.f32 %v5963_v14, %v5137_v24  ;;  %v5161_v2 = vmul.f32 %v5963_v14, %v5138_v6  ;;  %v5162_v42 = vmul.f32 %v5963_v14, %v5139_v28  ;;  %v5163_v50 = vmul.f32 %v5963_v14, %v5140_v1  ;;  %s7298_s22 = scalar_lea.vmem %s9026_s19, 2048  ;;  %p7303_p1 = scmp.lt.s32.totalorder %s9026_s19, %s9026_s19 }
 0x4c8   :  { %v5164_v45 = vmul.f32 %v5963_v14, %v5141_v36  ;;  %v5165_v57 = vmul.f32 %v5963_v14, %v5142_v39  ;;  %v5166_v43 = vmul.f32 %v5963_v14, %v5143_v34  ;;  %v5167_v9 = vmul.f32 %v5963_v14, %v5144_v62  ;;  %p7299_p0 = scmp.ne.s32.totalorder %s9026_s19, %s7298_s22  ;;  %p7304_p2 = scmp.lt.s32.totalorder %s7298_s22, %s7298_s22 }
 0x4c9   :  { %v5168_v0 = vmul.f32 %v5963_v14, %v5145_v49  ;;  %v5169_v60 = vmul.f32 %v5963_v14, %v5146_v20  ;;  %v5170_v29 = vmul.f32 %v5963_v14, %v5147_v27  ;;  %v5171_v61 = vmul.f32 %v5963_v14, %v5148_v54 }
 0x4ca   :  { %v5172_v10 = vmul.f32 %v5963_v14, %v5149_v16  ;;  %v5173_v41 = vmul.f32 %v5963_v14, %v5150_v18  ;;  %v5174_v37 = vmul.f32 %v5963_v14, %v5151_v25  ;;  %v5175_v32 = vmul.f32 %v5963_v14, %v5152_v30  ;;  %p7305_p3 = por %p7304_p2, %p7303_p1 }
 0x4cb   :  { %v5183_v63 = vadd.f32 %v5964_v26, %v5160_v12  ;;  %v5184_v40 = vadd.f32 %v5964_v26, %v5161_v2  ;;  %v5185_v7 = vadd.f32 %v5964_v26, %v5162_v42  ;;  %v5186_v38 = vadd.f32 %v5964_v26, %v5163_v50 }
 0x4cc   :  { %v5187_v46 = vadd.f32 %v5964_v26, %v5164_v45  ;;  %v5188_v17 = vadd.f32 %v5964_v26, %v5165_v57  ;;  %v5189_v33 = vadd.f32 %v5964_v26, %v5166_v43  ;;  %v5190_v35 = vadd.f32 %v5964_v26, %v5167_v9  ;;  %p7306_p4 = pnand %p7305_p3, %p7299_p0 }
 0x4cd   :  { %v5191_v44 = vadd.f32 %v5964_v26, %v5168_v0  ;;  %v5192_v15 = vadd.f32 %v5964_v26, %v5169_v60  ;;  %v5193_v53 = vadd.f32 %v5964_v26, %v5170_v29  ;;  %v5194_v55 = vadd.f32 %v5964_v26, %v5171_v61 }
 0x4ce   :  { %v5195_v3 = vadd.f32 %v5964_v26, %v5172_v10  ;;  %v5196_v21 = vadd.f32 %v5964_v26, %v5173_v41  ;;  %v5197_v24 = vadd.f32 %v5964_v26, %v5174_v37  ;;  %v5198_v6 = vadd.f32 %v5964_v26, %v5175_v32 }
 0x4cf   :  { %v5199_v28 = vadd.f32 %v5183_v63, %v8928_v13  ;;  %v5200_v1 = vadd.f32 %v5184_v40, %v8930_v51  ;;  %v5201_v36 = vadd.f32 %v5185_v7, %v8932_v4  ;;  %v5202_v39 = vadd.f32 %v5186_v38, %v8934_v5 }
 0x4d0   :  { %v8987_v34 = vadd.f32 %v5187_v46, %v8936_v52  ;;  %v8990_v62 = vadd.f32 %v5188_v17, %v8938_v19  ;;  %v8993_v14 = vadd.f32 %v5189_v33, %v8940_v31  ;;  %v8996_v49 = vadd.f32 %v5190_v35, %v8942_v22 }
 0x4d1   :  { %v8999_v13 = vadd.f32 %v5191_v44, %v8944_v47  ;;  %v9002_v51 = vadd.f32 %v5192_v15, %v8946_v48  ;;  %v9005_v4 = vadd.f32 %v5193_v53, %v8948_v59  ;;  %v9008_v5 = vadd.f32 %v5194_v55, %v8950_v23  ;;  %5215 = vst [vmem:[#allocation5] sm:$0xff] %v5199_v28 }
 0x4d2   :  { %5216 = vst [vmem:[#allocation5 + $0x8] sm:$0xff] %v5200_v1  ;;  %5217 = vst [vmem:[#allocation5 + $0x10] sm:$0xff] %v5201_v36  ;;  %v9011_v52 = vadd.f32 %v5195_v3, %v8952_v11  ;;  %v9014_v19 = vadd.f32 %v5196_v21, %v8954_v56  ;;  %v9017_v31 = vadd.f32 %v5197_v24, %v8956_v58  ;;  %v5231_v47 = vmax.f32 %v5199_v28, 0.0 }
 0x4d3   :  { %5218 = vst [vmem:[#allocation5 + $0x18] sm:$0xff] %v5202_v39  ;;  %v9020_v22 = vadd.f32 %v5198_v6, %v8958_v8  ;;  %5219 = vst [vmem:[#allocation5 + $0x20] sm:$0xff] %v8987_v34  ;;  %v5232_v48 = vmax.f32 %v5200_v1, 0.0  ;;  %v5233_v59 = vmax.f32 %v5201_v36, 0.0  ;;  %v5234_v23 = vmax.f32 %v5202_v39, 0.0 }
 0x4d4   :  { %5220 = vst [vmem:[#allocation5 + $0x28] sm:$0xff] %v8990_v62  ;;  %5221 = vst [vmem:[#allocation5 + $0x30] sm:$0xff] %v8993_v14  ;;  %v5235_v11 = vmax.f32 %v8987_v34, 0.0  ;;  %v5236_v56 = vmax.f32 %v8990_v62, 0.0  ;;  %v5237_v58 = vmax.f32 %v8993_v14, 0.0  ;;  %v5238_v8 = vmax.f32 %v8996_v49, 0.0 }
 0x4d5   :  { %5222 = vst [vmem:[#allocation5 + $0x38] sm:$0xff] %v8996_v49  ;;  %5223 = vst [vmem:[#allocation5 + $0x40] sm:$0xff] %v8999_v13  ;;  %v5239_v20 = vmax.f32 %v8999_v13, 0.0  ;;  %v5240_v27 = vmax.f32 %v9002_v51, 0.0  ;;  %v5241_v54 = vmax.f32 %v9005_v4, 0.0  ;;  %v5242_v16 = vmax.f32 %v9008_v5, 0.0 }
 0x4d6   :  { %5224 = vst [vmem:[#allocation5 + $0x48] sm:$0xff] %v9002_v51  ;;  %5225 = vst [vmem:[#allocation5 + $0x50] sm:$0xff] %v9005_v4 }
 0x4d7   :  { %5226 = vst [vmem:[#allocation5 + $0x58] sm:$0xff] %v9008_v5  ;;  %5227 = vst [vmem:[#allocation5 + $0x60] sm:$0xff] %v9011_v52 }
 0x4d8   :  { %5228 = vst [vmem:[#allocation5 + $0x68] sm:$0xff] %v9014_v19  ;;  %5229 = vst [vmem:[#allocation5 + $0x70] sm:$0xff] %v9017_v31 }
 0x4d9   :  { %5230 = vst [vmem:[#allocation5 + $0x78] sm:$0xff] %v9020_v22  ;;  %5247 = vst [vmem:[#allocation3] sm:$0xff] %v5231_v47 }
 0x4da   :  { %5248 = vst [vmem:[#allocation3 + $0x8] sm:$0xff] %v5232_v48  ;;  %5249 = vst [vmem:[#allocation3 + $0x10] sm:$0xff] %v5233_v59 }
 0x4db   :  { %5250 = vst [vmem:[#allocation3 + $0x18] sm:$0xff] %v5234_v23 }
 0x4dc   :  { %7309 = shalt.err (!%p7306_p4)
}
 0x4dd   :  { %s7310_s1 = scalar_lea.hbm %s9097_s11, 2048 }
 0x4de   :  { %p7311_p5 = scmp.ne.s32.totalorder %s9097_s11, %s7310_s1  ;;  %p7314_p6 = scmp.lt.u32.totalorder %s7310_s1, %s9097_s11 }
 0x4e0   :  { %p7316_p7 = pnand %p7314_p6, %p7311_p5 }
 0x4e2   :  { %7319 = shalt.err (!%p7316_p7)
}
 0x4e3   :  { %s7349_s29 = smov 128   ;;  %s7350_s2 = smov 8   ;;  %v5243_v18 = vmax.f32 %v9011_v52, 0.0  ;;  %v5244_v25 = vmax.f32 %v9014_v19, 0.0  ;;  %v5245_v30 = vmax.f32 %v9017_v31, 0.0  ;;  %v5246_v12 = vmax.f32 %v9020_v22, 0.0 }
 0x4e4   :  { %5286 = dma.vmem_to_hbm [thread:$0]  %s9026_s19, 2048, %s9097_s11, [#allocation6], %s7349_s29, %s7349_s29, %s7350_s2   ;;  %5251 = vst [vmem:[#allocation3 + $0x20] sm:$0xff] %v5235_v11  ;;  %5252 = vst [vmem:[#allocation3 + $0x28] sm:$0xff] %v5236_v56 }
 0x4e5   :  { %5253 = vst [vmem:[#allocation3 + $0x30] sm:$0xff] %v5237_v58  ;;  %5254 = vst [vmem:[#allocation3 + $0x38] sm:$0xff] %v5238_v8  ;;  %s7320_s11 = scalar_lea.vmem %s5269_s21, 2048  ;;  %p7325_p9 = scmp.lt.s32.totalorder %s5269_s21, %s5269_s21 }
 0x4e6   :  { %5255 = vst [vmem:[#allocation3 + $0x40] sm:$0xff] %v5239_v20  ;;  %5256 = vst [vmem:[#allocation3 + $0x48] sm:$0xff] %v5240_v27  ;;  %p7321_p8 = scmp.ne.s32.totalorder %s5269_s21, %s7320_s11  ;;  %p7326_p10 = scmp.lt.s32.totalorder %s7320_s11, %s7320_s11 }
 0x4e7   :  { %5257 = vst [vmem:[#allocation3 + $0x50] sm:$0xff] %v5241_v54  ;;  %5258 = vst [vmem:[#allocation3 + $0x58] sm:$0xff] %v5242_v16 }
 0x4e8   :  { %5259 = vst [vmem:[#allocation3 + $0x60] sm:$0xff] %v5243_v18  ;;  %5260 = vst [vmem:[#allocation3 + $0x68] sm:$0xff] %v5244_v25  ;;  %p7327_p11 = por %p7326_p10, %p7325_p9 }
 0x4e9   :  { %5261 = vst [vmem:[#allocation3 + $0x70] sm:$0xff] %v5245_v30  ;;  %5262 = vst [vmem:[#allocation3 + $0x78] sm:$0xff] %v5246_v12 }
 0x4ea   :  { %p7328_p12 = pnand %p7327_p11, %p7321_p8 }
 0x4ec   :  { %7331 = shalt.err (!%p7328_p12)
}
 0x4ed   :  { %s7332_s13 = scalar_lea.hbm %s9096_s10, 2048 }
 0x4ee   :  { %p7333_p13 = scmp.ne.s32.totalorder %s9096_s10, %s7332_s13  ;;  %p7336_p0 = scmp.lt.u32.totalorder %s7332_s13, %s9096_s10 }
 0x4f0   :  { %p7338_p1 = pnand %p7336_p0, %p7333_p13 }
 0x4f2   :  { %7341 = shalt.err (!%p7338_p1)
}
 0x4f3   :  { %5274 = dma.vmem_to_hbm [thread:$0]  %s5269_s21, 2048, %s9096_s10, [#allocation4], %s7349_s29, %s7349_s29, %s7350_s2  }
 0x4f4   :  { %7342 = dma.done.wait [#allocation4], 2048  }
 0x4f5   :  { %7343 = vsyncadd [#allocation4], 4294965248 }
 0x4f6   :  { %7344 = dma.done.wait [#allocation6], 2048  }
 0x4f7   :  { %7345 = vsyncadd [#allocation6], 4294965248 }
 0x4f8   :  { %5293 = vsyncpa [#allocation4], 1 }
 0x4f9   :  { %5294 = vsyncpa [#allocation6], 1 }

</bundles_post_ra>
